<compile_context>
chip_gen: v7x
topology: tpu7x:2x2x1
jax: 0.10.0
libtpu: 0.0.40
codegen_flags: <defaults>
</compile_context>

<pallas_src>
import jax
import jax.numpy as jnp
from jax.experimental import pallas as pl
from jax.experimental.pallas import tpu as pltpu


def _nonlocal_kernel(hw, ci, block_b):
    def kernel(x_ref, wgt_ref, ww_ref, o_ref, proj_ref, y_ref):
        # x_ref / o_ref : (C, block_b*HW)
        # wgt_ref       : (2*Ci, C)   stacked [Wg; Wtheta]
        # ww_ref        : (C, Ci)
        # proj_ref      : (2*Ci, block_b*HW) f32 scratch  (g / theta slab)
        # y_ref         : (Ci,   block_b*HW) f32 scratch  (attention output)

        # Hoisted 1x1-conv projections: one MXU launch for the whole packed
        # block (M = 2*Ci, K = C, N = block_b*HW).
        proj_ref[...] = jnp.dot(wgt_ref[...], x_ref[...],
                                preferred_element_type=jnp.float32)
        inv_ci = 1.0 / float(ci)

        # Walk the packed batch elements; only one element's (HW, HW)
        # temporaries are live at a time.
        @pl.loop(0, block_b)
        def _(b):
            off = pl.multiple_of(b * hw, 128)                   # lane-aligned
            g = proj_ref[pl.ds(0, ci), pl.ds(off, hw)]          # (Ci, HW)
            th = proj_ref[pl.ds(ci, ci), pl.ds(off, hw)]        # (Ci, HW)

            # count_cov_second: remove per-position channel mean; fold the
            # 1/Ci scale into the small (Ci, HW) operand (not the HW x HW f).
            th_c = (th - jnp.mean(th, axis=0, keepdims=True)) * inv_ci

            # f[i,j] = sum_c th_c[c,i] * th[c,j]  -> (HW, HW); only the tiny
            # (Ci, HW) operand plays the transposed role.
            f = jax.lax.dot_general(
                th_c, th, (((0,), (0,)), ((), ())),
                preferred_element_type=jnp.float32)

            # Row softmax; normalization is deferred past the value matmul so
            # the EUP only runs exp and no (HW,HW) divide/multiply is needed.
            m = jnp.max(f, axis=-1, keepdims=True)
            s = jnp.exp(f - m)                                  # (HW, HW)
            denom = jnp.sum(s, axis=-1, keepdims=True)          # (HW, 1)

            # yt[i,c] = sum_j s[i,j] * g[c,j]  -> (HW, Ci); s is the natural
            # LHS, only the Ci-wide g is in transposed position.
            yt = jax.lax.dot_general(
                s, g, (((1,), (1,)), ((), ())),
                preferred_element_type=jnp.float32)
            yt = yt * pl.reciprocal(denom, approx=True)         # normalize

            # Store in (Ci, HW) layout (lane-dense) for the hoisted out-conv.
            y_ref[:, pl.ds(off, hw)] = jnp.transpose(yt)        # tiny xpose

        # Hoisted output 1x1 conv + residual: one matmul + one lane-dense
        # slab store for the whole packed block.
        wy = jnp.dot(ww_ref[...], y_ref[...], preferred_element_type=jnp.float32)
        o_ref[...] = (wy + x_ref[...]).astype(o_ref.dtype)

    return kernel


def _default_vmem_limit_bytes():
    """Per-generation VMEM limit: ~3/4 of physical, capped at 100 MiB.
    v5e/v6e (128 MiB) -> 96 MiB; v7x (64 MiB) -> 48 MiB; fallback 48 MiB."""
    cap = 64 * 1024 * 1024
    try:
        cap = int(getattr(pltpu.get_tpu_info(), "vmem_capacity_bytes", cap))
    except Exception:
        pass
    return min(100 * 1024 * 1024, (cap * 3) // 4)


def _auto_block_b(bsz, ch, ci, hw, itemsize, vmem_limit_bytes):
    """Largest divisor of bsz whose VMEM footprint fits, keeping grid >= 2."""
    if hw % 128 != 0:
        # Lane block must equal the full (B*HW) extent if HW is not 128-aligned.
        return bsz
    # in + out blocks are double-buffered; scratch (proj + y) is single-buffered;
    # budget ~3 co-live (HW, HW) f32 softmax temporaries (f, f - m, exp).
    fixed = 3 * hw * hw * 4 + 8 * ci * hw * 4 + 3 * ci * ch * 4
    per_b = 4 * ch * hw * itemsize + 3 * ci * hw * 4
    budget = (vmem_limit_bytes * 9) // 10
    best = 1
    for cand in range(1, bsz + 1):
        if bsz % cand == 0 and fixed + cand * per_b <= budget:
            best = cand
    # Keep at least 2 grid steps when possible so the "parallel" batch axis
    # can feed both TensorCores on dual-core chips (v7x); the extra grid step
    # costs ~0.35 us on single-core chips.
    if best == bsz and bsz >= 2:
        for cand in range(bsz // 2, 0, -1):
            if bsz % cand == 0:
                best = cand
                break
    return best


def nonlocal_forward(x, w_g, w_theta, w_w, *, block_b=None, vmem_limit_bytes=None):
    """x: (B, C, H, W).  Weights in squeezed PyTorch Conv2d layouts:
       w_g, w_theta: (Ci, C)  from Conv2d(C, Ci, 1).weight (Ci, C, 1, 1)
       w_w:          (C, Ci)  from Conv2d(Ci, C, 1).weight (C, Ci, 1, 1)
    """
    bsz, ch, hh, wd = x.shape
    hw = hh * wd
    ci = w_theta.shape[0]

    if vmem_limit_bytes is None:
        vmem_limit_bytes = _default_vmem_limit_bytes()
    if block_b is None:
        block_b = _auto_block_b(bsz, ch, ci, hw, x.dtype.itemsize, vmem_limit_bytes)
    grid = (bsz // block_b,)

    # Present the activations as one lane-dense (C, B*HW) slab (batch*spatial
    # on lanes); this is what lets the projections / output conv run as single
    # matmuls over a whole packed block and keeps every store lane-dense.
    x_slab = jnp.transpose(x.reshape(bsz, ch, hw), (1, 0, 2)).reshape(ch, bsz * hw)
    w_gt = jnp.concatenate([w_g, w_theta], axis=0)              # (2*Ci, C)

    # TODO(synk): for very large H*W where ~3 x (HW,HW) x 4 B exceeds the
    # per-generation VMEM budget (v7x's 64 MiB hits first), add an HW-tiled
    # online-softmax (flash-style) variant.
    # TODO(synk): optional bf16 MXU path for the two HW^2*Ci contractions on
    # v6e/v7x (f32 accumulation kept); needs tolerance re-validation.

    out_slab = pl.pallas_call(
        _nonlocal_kernel(hw, ci, block_b),
        out_shape=jax.ShapeDtypeStruct((ch, bsz * hw), x.dtype),
        grid_spec=pltpu.PrefetchScalarGridSpec(
            num_scalar_prefetch=0,
            grid=grid,
            in_specs=[
                pl.BlockSpec((ch, block_b * hw), lambda i: (0, i)),
                pl.BlockSpec((2 * ci, ch), lambda i: (0, 0)),
                pl.BlockSpec((ch, ci), lambda i: (0, 0)),
            ],
            out_specs=pl.BlockSpec((ch, block_b * hw), lambda i: (0, i)),
            scratch_shapes=[
                pltpu.VMEM((2 * ci, block_b * hw), jnp.float32),
                pltpu.VMEM((ci, block_b * hw), jnp.float32),
            ],
        ),
        compiler_params=pltpu.CompilerParams(
            dimension_semantics=("parallel",),
            vmem_limit_bytes=vmem_limit_bytes,
        ),
        # Each grid step writes exactly the slab columns it read, after fully
        # consuming them, so reusing the activation buffer is safe.
        input_output_aliases={0: 0},
    )(x_slab, w_gt, w_w)

    return jnp.transpose(out_slab.reshape(ch, bsz, hw), (1, 0, 2)).reshape(
        bsz, ch, hh, wd)


def nonlocal_reference(x, w_g, w_theta, w_w):
    """Plain-JAX reference mirroring the PyTorch forward line by line."""
    bsz, ch, hh, wd = x.shape
    hw = hh * wd
    ci = w_theta.shape[0]
    xf = x.reshape(bsz, ch, hw)
    g_x = jnp.einsum('ic,bcs->bsi', w_g, xf)                 # (b, hw, ci)
    th = jnp.einsum('ic,bcs->bsi', w_theta, xf)              # (b, hw, ci)
    mean = jnp.mean(th, axis=2, keepdims=True)               # (b, hw, 1)
    f = jnp.matmul(th - mean, jnp.transpose(th, (0, 2, 1))) / ci   # (b, hw, hw)
    p = jax.nn.softmax(f, axis=-1)
    y = jnp.matmul(p, g_x)                                   # (b, hw, ci)
    y = jnp.transpose(y, (0, 2, 1))                          # (b, ci, hw)
    wy = jnp.einsum('ki,bis->bks', w_w, y)                   # (b, c, hw)
    return (wy + xf).reshape(bsz, ch, hh, wd)


if __name__ == "__main__":
    # Small shapes consistent with the module (in_channels >= reduction so
    # inter_channels = in_channels // reduction >= 1).  HW = 256 (lane-dense).
    B, C, H, W = 2, 32, 16, 16
    REDUCTION = 8
    CI = C // REDUCTION                  # inter_channels = 4

    key = jax.random.PRNGKey(0)
    kx, kg, kt, kw = jax.random.split(key, 4)
    x = jax.random.normal(kx, (B, C, H, W), dtype=jnp.float32)
    # Squeezed PyTorch 1x1-conv weights.  NOTE: the module zero-inits W.weight
    # (making z == x at init); random values here keep the attention path
    # numerically observable while preserving the forward semantics.
    w_g = jax.random.normal(kg, (CI, C), dtype=jnp.float32) * 0.1
    w_theta = jax.random.normal(kt, (CI, C), dtype=jnp.float32) * 0.1
    w_w = jax.random.normal(kw, (C, CI), dtype=jnp.float32) * 0.1

    fwd = jax.jit(nonlocal_forward)
    out = jax.block_until_ready(fwd(x, w_g, w_theta, w_w))

    ref = nonlocal_reference(x, w_g, w_theta, w_w)
    assert out.shape == (B, C, H, W)
    # Tolerance sized for TPU f32 MXU rounding differences between the Mosaic
    # and XLA lowerings plus the EUP approximate-reciprocal softmax
    # normalization (relative error well below 1e-3).
    assert jnp.allclose(out, ref, atol=3e-3, rtol=3e-3), "mismatch vs reference"
    print("KERNEL_OK")
</pallas_src>

<mosaic_0001>
module attributes {stable_mosaic.version = 11 : i64} {
  func.func @kernel(%arg0: i32, %arg1: memref<32x256xf32, #tpu.memory_space<vmem>>, %arg2: memref<8x32xf32, #tpu.memory_space<vmem>>, %arg3: memref<32x4xf32, #tpu.memory_space<vmem>>, %arg4: memref<32x256xf32, #tpu.memory_space<vmem>>, %arg5: memref<8x256xf32, #tpu.memory_space<vmem>>, %arg6: memref<4x256xf32, #tpu.memory_space<vmem>>) attributes {dimension_semantics = [#tpu.dimension_semantics<parallel>], iteration_bounds = array<i64: 2>, scalar_prefetch = 0 : i64, scratch_operands = 2 : i64, tpu.core_type = #tpu.core_type<tc>, window_params = [{transform_indices = @transform_0, window_bounds = array<i64: 32, 256>}, {pipeline_mode = #tpu.pipeline_mode<synchronous>, transform_indices = @transform_1, window_bounds = array<i64: 8, 32>}, {pipeline_mode = #tpu.pipeline_mode<synchronous>, transform_indices = @transform_2, window_bounds = array<i64: 32, 4>}, {transform_indices = @transform_3, window_bounds = array<i64: 32, 256>}]} {
    %c0 = arith.constant 0 : index
    %c0_0 = arith.constant 0 : index
    %0 = vector.load %arg2[%c0, %c0_0] : memref<8x32xf32, #tpu.memory_space<vmem>>, vector<8x32xf32>
    %c0_1 = arith.constant 0 : index
    %c0_2 = arith.constant 0 : index
    %1 = vector.load %arg1[%c0_1, %c0_2] : memref<32x256xf32, #tpu.memory_space<vmem>>, vector<32x256xf32>
    %cst = arith.constant dense<0.000000e+00> : vector<8x256xf32>
    %2 = tpu.matmul %0, %1, %cst {dimension_numbers = #tpu.dot_dimension_numbers<[1], [0], [0], [1], [0, 0, 1, 1], [], []>} : vector<8x32xf32>, vector<32x256xf32>, vector<8x256xf32> -> vector<8x256xf32>
    %c0_3 = arith.constant 0 : index
    %c0_4 = arith.constant 0 : index
    %3 = vector.load %arg5[%c0_3, %c0_4] : memref<8x256xf32, #tpu.memory_space<vmem>>, vector<8x256xf32>
    tpu.vector_store %arg5[%c0_3, %c0_4], %2 {strides = array<i32>} : memref<8x256xf32, #tpu.memory_space<vmem>>, vector<8x256xf32>,
    %c0_i32 = arith.constant 0 : i32
    %c1_i32 = arith.constant 1 : i32
    %4 = arith.muli %c0_i32, %c1_i32 : i32
    %c0_i32_5 = arith.constant 0 : i32
    %5 = arith.addi %c0_i32_5, %4 : i32
    %c256_i32 = arith.constant 256 : i32
    %6 = arith.muli %5, %c256_i32 : i32
    %7 = tpu.assume_multiple %6, 128 : i32
    %c0_6 = arith.constant 0 : index
    %8 = arith.index_cast %7 : i32 to index
    %9 = vector.load %arg5[%c0_6, %8] : memref<8x256xf32, #tpu.memory_space<vmem>>, vector<4x256xf32>
    %c4 = arith.constant 4 : index
    %10 = arith.index_cast %7 : i32 to index
    %11 = vector.load %arg5[%c4, %10] : memref<8x256xf32, #tpu.memory_space<vmem>>, vector<4x256xf32>
    %cst_7 = arith.constant dense<0.000000e+00> : vector<256xf32>
    %12 = vector.multi_reduction <add>, %11, %cst_7 [0] : vector<4x256xf32> to vector<256xf32>
    %13 = vector.shape_cast %12 : vector<256xf32> to vector<1x256xf32>
    %cst_8 = arith.constant 4.000000e+00 : f32
    %14 = vector.broadcast %cst_8 : f32 to vector<1x256xf32>
    %15 = arith.divf %13, %14 : vector<1x256xf32>
    %16 = vector.broadcast %15 : vector<1x256xf32> to vector<4x256xf32>
    %17 = arith.subf %11, %16 : vector<4x256xf32>
    %cst_9 = arith.constant 2.500000e-01 : f32
    %18 = vector.broadcast %cst_9 : f32 to vector<4x256xf32>
    %19 = arith.mulf %17, %18 : vector<4x256xf32>
    %cst_10 = arith.constant dense<0.000000e+00> : vector<256x256xf32>
    %20 = tpu.matmul %19, %11, %cst_10 {dimension_numbers = #tpu.dot_dimension_numbers<[0], [0], [1], [1], [0, 1, 1, 1], [], []>} : vector<4x256xf32>, vector<4x256xf32>, vector<256x256xf32> -> vector<256x256xf32>
    %cst_11 = arith.constant dense<0xFF800000> : vector<256xf32>
    %21 = vector.multi_reduction <maximumf>, %20, %cst_11 [1] : vector<256x256xf32> to vector<256xf32>
    %22 = vector.shape_cast %21 : vector<256xf32> to vector<256x1xf32>
    %23 = vector.broadcast %22 : vector<256x1xf32> to vector<256x256xf32>
    %24 = arith.subf %20, %23 : vector<256x256xf32>
    %25 = math.exp %24 : vector<256x256xf32>
    %cst_12 = arith.constant dense<0.000000e+00> : vector<256xf32>
    %26 = vector.multi_reduction <add>, %25, %cst_12 [1] : vector<256x256xf32> to vector<256xf32>
    %27 = vector.shape_cast %26 : vector<256xf32> to vector<256x1xf32>
    %cst_13 = arith.constant dense<0.000000e+00> : vector<256x4xf32>
    %28 = tpu.matmul %25, %9, %cst_13 {dimension_numbers = #tpu.dot_dimension_numbers<[1], [1], [0], [0], [0, 0, 1, 0], [], []>} : vector<256x256xf32>, vector<4x256xf32>, vector<256x4xf32> -> vector<256x4xf32>
    %29 = tpu.reciprocal %27 {approx = true} : vector<256x1xf32> -> vector<256x1xf32>
    %30 = vector.broadcast %29 : vector<256x1xf32> to vector<256x4xf32>
    %31 = arith.mulf %28, %30 : vector<256x4xf32>
    %32 = tpu.transpose %31, [1, 0] : vector<256x4xf32> -> vector<4x256xf32>
    %c0_14 = arith.constant 0 : index
    %33 = arith.index_cast %7 : i32 to index
    %34 = vector.load %arg6[%c0_14, %33] : memref<4x256xf32, #tpu.memory_space<vmem>>, vector<4x256xf32>
    tpu.vector_store %arg6[%c0_14, %33], %32 {strides = array<i32>} : memref<4x256xf32, #tpu.memory_space<vmem>>, vector<4x256xf32>,
    %c1_i32_15 = arith.constant 1 : i32
    %c0_16 = arith.constant 0 : index
    %c0_17 = arith.constant 0 : index
    %35 = vector.load %arg3[%c0_16, %c0_17] : memref<32x4xf32, #tpu.memory_space<vmem>>, vector<32x4xf32>
    %c0_18 = arith.constant 0 : index
    %c0_19 = arith.constant 0 : index
    %36 = vector.load %arg6[%c0_18, %c0_19] : memref<4x256xf32, #tpu.memory_space<vmem>>, vector<4x256xf32>
    %cst_20 = arith.constant dense<0.000000e+00> : vector<32x256xf32>
    %37 = tpu.matmul %35, %36, %cst_20 {dimension_numbers = #tpu.dot_dimension_numbers<[1], [0], [0], [1], [0, 0, 1, 1], [], []>} : vector<32x4xf32>, vector<4x256xf32>, vector<32x256xf32> -> vector<32x256xf32>
    %c0_21 = arith.constant 0 : index
    %c0_22 = arith.constant 0 : index
    %38 = vector.load %arg1[%c0_21, %c0_22] : memref<32x256xf32, #tpu.memory_space<vmem>>, vector<32x256xf32>
    %39 = arith.addf %37, %38 : vector<32x256xf32>
    %c0_23 = arith.constant 0 : index
    %c0_24 = arith.constant 0 : index
    %40 = vector.load %arg4[%c0_23, %c0_24] : memref<32x256xf32, #tpu.memory_space<vmem>>, vector<32x256xf32>
    tpu.vector_store %arg4[%c0_23, %c0_24], %39 {strides = array<i32>} : memref<32x256xf32, #tpu.memory_space<vmem>>, vector<32x256xf32>,
    return
  }
  func.func @transform_0(%arg0: i32) -> (i32, i32) {
    %c0_i32 = arith.constant 0 : i32
    %c0_i32_0 = arith.constant 0 : i32
    return %c0_i32, %arg0 : i32, i32
  }
  func.func @transform_1(%arg0: i32) -> (i32, i32) {
    %c0_i32 = arith.constant 0 : i32
    %c0_i32_0 = arith.constant 0 : i32
    %c0_i32_1 = arith.constant 0 : i32
    return %c0_i32, %c0_i32_0 : i32, i32
  }
  func.func @transform_2(%arg0: i32) -> (i32, i32) {
    %c0_i32 = arith.constant 0 : i32
    %c0_i32_0 = arith.constant 0 : i32
    %c0_i32_1 = arith.constant 0 : i32
    return %c0_i32, %c0_i32_0 : i32, i32
  }
  func.func @transform_3(%arg0: i32) -> (i32, i32) {
    %c0_i32 = arith.constant 0 : i32
    %c0_i32_0 = arith.constant 0 : i32
    return %c0_i32, %arg0 : i32, i32
  }
}

</mosaic_0001>

<bundles_post_ra>
// kernel: nonlocal_forward.1
= control target key start
LH: loop header
LB: loop body
LE: loop exit
PB: predicated region body
PF: predicated region fallthrough
CT: control target
= control target key end

     0   :  { %s2043_s12 = smov 0   ;;  %s2045_s13 = smov 0   ;;  %s2493_s0 = inlined_call_operand.vmem [shape: f32[32,512], index: 0, kind: input, shape index: {}, may-alias: {0,3}]   ;;  %s2494_s1 = inlined_call_operand.vmem [shape: f32[8,32], index: 1, kind: input, shape index: {}]   ;;  %s2495_s2 = inlined_call_operand.vmem [shape: f32[32,4], index: 2, kind: input, shape index: {}]   ;;  %s2496_s3 = inlined_call_operand.vmem [shape: f32[32,512], index: 3, kind: output, shape index: {}, may-alias: {0,3}]  }
   0x1   :  { %s2047_s14 = smov 0  }
   0x2 LB: > { %s1714_s15 = sadd.s32 4294967295, %s2020_s14   ;;  %s2060_s16 = sadd.s32 1, %s2020_s14   ;;  %s2020_s14 = sphi %s2047_s14, %s2542_s14   ;;  %s2016_s13 = sphi %s2045_s13, %s2541_s13   ;;  %s2012_s12 = sphi %s2043_s12, %s2540_s12  }
   0x3   : > { %s17_s17 = ssub.s32 %s2020_s14, %s2060_s16  ;;  %s20_s18 = sadd.s32 1, %s2016_s13 }
   0x4   : > { %p18_p0 = scmp.eq.s32.totalorder %s17_s17, 0  ;;  %p27_p1 = scmp.ne.s32.totalorder %s2016_s13, %s2012_s12 }
   0x5   : > { %p28_p2 = scmp.eq.s32.totalorder %s2020_s14, 0  ;;  %p99_p3 = scmp.eq.s32.totalorder %s1714_s15, 1 }
   0x6   : > { %s2071_s19 = scalar_select %p18_p0, %s2016_s13, %s20_s18  }
   0x7   : > { %p29_p4 = por %p28_p2, %p27_p1  ;;  %p2073_p5 = por %p99_p3, %p27_p1 }
   0x8   : > { %p1717_p6 = scmp.ge.s32.totalorder %s2020_s14, 2 }
   0xa   : > { %127 = sbr.rel (%p1717_p6) target bundleno = 25 (0x19), region = 24 }
  0x11   : > { %130 = sbr.rel (!%p29_p4) target bundleno = 25 (0x19), region = 28  ;;  %s132_s21 = sand.u32 (%p29_p4), 1, %s2016_s13  }
  0x12   : > { %s1770_s22 = sshll.u32 (%p29_p4), %s2020_s14, 4  ;;  %s1718_s23 = sshll.u32 (%p29_p4), %s132_s21, 6 }
  0x13   : > { %s137_s26 = scalar_lea.vmem (%p29_p4), %s2493_s0, %s1770_s22  ;;  %s134_s27 = scalar_lea.vmem (%p29_p4), [#allocation4], %s1718_s23 }
  0x14   : > { %v150_v0 = vld [vmem:[%s137_s26] sm:$0xff] (%p29_p4)  ;;  %v152_v1 = vld [vmem:[%s137_s26 + $0x8] sm:$0xff] (%p29_p4) }
  0x15   : > { %v154_v2 = vld [vmem:[%s137_s26 + $0x20] sm:$0xff] (%p29_p4)  ;;  %151 = vst [vmem:[%s134_s27] sm:$0xff] (%p29_p4), %v150_v0  ;;  %153 = vst [vmem:[%s134_s27 + $0x8] sm:$0xff] (%p29_p4), %v152_v1  ;;  %v156_v3 = vld [vmem:[%s137_s26 + $0x28] sm:$0xff] (%p29_p4) }
  0x16   : > { %155 = vst [vmem:[%s134_s27 + $0x10] sm:$0xff] (%p29_p4), %v154_v2  ;;  %v158_v4 = vld [vmem:[%s137_s26 + $0x40] sm:$0xff] (%p29_p4)  ;;  %v160_v5 = vld [vmem:[%s137_s26 + $0x48] sm:$0xff] (%p29_p4)  ;;  %157 = vst [vmem:[%s134_s27 + $0x18] sm:$0xff] (%p29_p4), %v156_v3 }
  0x17   : > { %159 = vst [vmem:[%s134_s27 + $0x20] sm:$0xff] (%p29_p4), %v158_v4  ;;  %161 = vst [vmem:[%s134_s27 + $0x28] sm:$0xff] (%p29_p4), %v160_v5  ;;  %v162_v6 = vld [vmem:[%s137_s26 + $0x60] sm:$0xff] (%p29_p4)  ;;  %v164_v7 = vld [vmem:[%s137_s26 + $0x68] sm:$0xff] (%p29_p4) }
  0x18   : > { %163 = vst [vmem:[%s134_s27 + $0x30] sm:$0xff] %v162_v6  ;;  %165 = vst [vmem:[%s134_s27 + $0x38] sm:$0xff] %v164_v7 }
  0x19 PF: > { %p1721_p7 = scmp.ge.s32.totalorder %s2020_s14, 1  ;;  %p170_p8 = scmp.lt.s32.totalorder %s2020_s14, 3 }
  0x1b   : > { %p171_p9 = pnand %p1721_p7, %p170_p8 }
  0x1d   : > { %174 = sbr.rel (%p171_p9) target bundleno = 1443 (0x5a3), region = 51 }
  0x24   : > { %s177_s28 = sand.u32 1, %s2012_s12   ;;  %v2497_v8 = vmov 0.0   ;;  %v201_v21 = vld [vmem:[%s2494_s1] sm:$0xff]  ;;  %vm210_vm0 = vcmask 261120   ;;  %vm297_vm1 = vcmask 1043456   ;;  %vm389_vm2 = vcmask 31744  }
  0x25   : > { %s2086_s29 = sshll.u32 %s177_s28, 6  ;;  %278 = vmatprep.mubr.f32.mxu0 %v2497_v8  ;;  %554 = vmatprep.mubr.f32.mxu1 %v2497_v8  ;;  %s1771_s21 = sshll.u32 (%p2073_p5), %s1714_s15, 4 }
  0x26   : > { %s2091_s30 = scalar_lea.vmem [#allocation4], %s2086_s29  ;;  %s2453_s18 = scalar_lea.vmem [#allocation5], %s2086_s29 }
  0x27   : > { %v203_v9 = vld [vmem:[%s2091_s30 + $0x8] sm:$0xff]  ;;  %v205_v10 = vld [vmem:[%s2091_s30 + $0x18] sm:$0xff]  ;;  %v202_v11 = vld [vmem:[%s2091_s30] sm:$0xff]  ;;  %s1626_s24 = scalar_lea.vmem (%p2073_p5), %s2496_s3, %s1771_s21 }
  0x28   : > { %v1773_v12 = vpack.c.bf16 %v205_v10, %v203_v9  ;;  %v204_v13 = vld [vmem:[%s2091_s30 + $0x10] sm:$0xff]  ;;  %v207_v14 = vld [vmem:[%s2091_s30 + $0x28] sm:$0xff]  ;;  %v209_v15 = vld [vmem:[%s2091_s30 + $0x38] sm:$0xff] }
  0x29   : > { %v1775_v16 = vpack.c.bf16 %v204_v13, %v202_v11  ;;  %v1777_v17 = vpack.c.bf16 %v209_v15, %v207_v14  ;;  %v206_v18 = vld [vmem:[%s2091_s30 + $0x20] sm:$0xff]  ;;  %v208_v19 = vld [vmem:[%s2091_s30 + $0x30] sm:$0xff] }
  0x2a   : > { %1774 = vmatprep.subr.bf16.mxu0 %v1773_v12  ;;  %v1779_v20 = vpack.c.bf16 %v208_v19, %v206_v18 }
  0x2b   : > { %1776 = vmatpush1.bf16.msra.mxu0 %v1775_v16 }
  0x2c   : > { %1778 = vmatprep.subr.bf16.mxu0 %v1777_v17 }
  0x2f   : > { %1780 = vmatpush1.bf16.msra.mxu0 %v1779_v20 }
  0x32   : > { %1724 = vmatmul.mubr.msk.f32.vlgmr.msra.gmra.mrb[0].mxu0 %vm210_vm0, %v201_v21 }
 0x105   : > { %v280_v22 = vpop.f32.mrb[0].mxu0 }
 0x106   : > { %285 = vst [vmem:[#allocation2] sm:$0xff] %v280_v22  ;;  %v282_v23 = vpop.f32.mrb[1].mxu0 }
 0x107   : > { %286 = vst [vmem:[#allocation2 + $0x8] sm:$0xff] %v282_v23 }
 0x10d   : > { %v289_v24 = vld [vmem:[#allocation2] sm:$0xf0]  ;;  %v287_v28 = vld [vmem:[#allocation2] sm:$0xf] }
 0x10e   : > { %v288_v25 = vld [vmem:[#allocation2 + $0x8] sm:$0xf]  ;;  %v290_v26 = vld [vmem:[#allocation2 + $0x8] sm:$0xf0]  ;;  %v293_v27 = vrot.slane %v289_v24, 4 }
 0x10f   : > { %1131 = vmatprep.subr.mxu0 %v288_v25  ;;  %v294_v29 = vrot.slane %v290_v26, 4 }
 0x110   : > { %1132 = vmatpush1.xpose.msra.mxu0 %v287_v28  ;;  %v298_v30 = vsel %vm297_vm1, %v293_v27, 0.0 }
 0x111   : > { %1725 = vmatprep.subr.msk.mxu1 %vm297_vm1, %v294_v29  ;;  %v299_v31 = vrot.slane %v298_v30, 4  ;;  %v305_v41 = vsel %vm297_vm1, %v294_v29, 0.0 }
 0x112   : > { %1726 = vmatpush1.msk.msra.mxu1 %vm297_vm1, %v293_v27  ;;  %v306_v42 = vrot.slane %v305_v41, 4 }
 0x113   : > { %v300_v32 = vadd.f32 %v299_v31, %v298_v30 }
 0x114   : > { %v307_v43 = vadd.f32 %v306_v42, %v305_v41 }
 0x115   : > { %v301_v33 = vrot.slane %v300_v32, 2 }
 0x116   : > { %v308_v44 = vrot.slane %v307_v43, 2 }
 0x117   : > { %v302_v34 = vadd.f32 %v301_v33, %v300_v32 }
 0x118   : > { %v309_v45 = vadd.f32 %v308_v44, %v307_v43 }
 0x119   : > { %v303_v35 = vrot.slane %v302_v34, 1 }
 0x11a   : > { %v310_v46 = vrot.slane %v309_v45, 1 }
 0x11b   : > { %v304_v36 = vadd.f32 %v303_v35, %v302_v34 }
 0x11c   : > { %v311_v47 = vadd.f32 %v310_v46, %v309_v45 }
 0x11d   : > { %v313_v37 = vmul.f32 0.25, %v304_v36 }
 0x11e   : > { %v314_v48 = vmul.f32 0.25, %v311_v47 }
 0x11f   : > { %v315_v38 = vsub.f32 %v289_v24, %v313_v37 }
 0x120   : > { %v316_v49 = vsub.f32 %v290_v26, %v314_v48 }
 0x121   : > { %v317_v39 = vmul.f32 0.25, %v315_v38 }
 0x122   : > { %v318_v50 = vmul.f32 0.25, %v316_v49 }
 0x123   : > { %v321_v40 = vrot.slane %v317_v39, 4 }
 0x124   : > { %v322_v51 = vrot.slane %v318_v50, 4 }
 0x125   : > { %325 = vxpose.xlu0.b32.start.end [1/1] (short) %v321_v40, 128 }
 0x162   : > { %357 = vxpose.xlu0.b32.start.end [1/1] (short) %v322_v51, 128 }
 0x1a5   : > { %v341_v52 = vpop.trf.xlu0 }
 0x1a6   : > { %1727 = vmatmul.mubr.msk.f32.vlgmr.msra.gmra.mrb[0].mxu1 %vm389_vm2, %v341_v52 }
 0x1a7   : > { %560 = vmatprep.mubr.f32.mxu1 %v2497_v8 }
 0x1a9   : > { %v342_v53 = vpop.trf.xlu0 }
 0x1aa   : > { %1728 = vmatmul.mubr.msk.f32.gmra.mrb[2].mxu1 %vm389_vm2, %v342_v53 }
 0x1ab   : > { %566 = vmatprep.mubr.f32.mxu1 %v2497_v8 }
 0x1ad   : > { %v343_v54 = vpop.trf.xlu0 }
 0x1ae   : > { %1729 = vmatmul.mubr.msk.f32.gmra.mrb[4].mxu1 %vm389_vm2, %v343_v54 }
 0x1af   : > { %572 = vmatprep.mubr.f32.mxu1 %v2497_v8 }
 0x1b1   : > { %v344_v55 = vpop.trf.xlu0 }
 0x1b2   : > { %1730 = vmatmul.mubr.msk.f32.gmra.mrb[6].mxu1 %vm389_vm2, %v344_v55 }
 0x1b3   : > { %578 = vmatprep.mubr.f32.mxu1 %v2497_v8 }
 0x1b5   : > { %v345_v56 = vpop.trf.xlu0 }
 0x1b6   : > { %1731 = vmatmul.mubr.msk.f32.gmra.mrb[8].mxu1 %vm389_vm2, %v345_v56 }
 0x1b7   : > { %584 = vmatprep.mubr.f32.mxu1 %v2497_v8 }
 0x1b9   : > { %v346_v57 = vpop.trf.xlu0 }
 0x1ba   : > { %1732 = vmatmul.mubr.msk.f32.gmra.mrb[10].mxu1 %vm389_vm2, %v346_v57 }
 0x1bb   : > { %590 = vmatprep.mubr.f32.mxu1 %v2497_v8 }
 0x1bd   : > { %v347_v58 = vpop.trf.xlu0 }
 0x1be   : > { %1733 = vmatmul.mubr.msk.f32.gmra.mrb[12].mxu1 %vm389_vm2, %v347_v58 }
 0x1bf   : > { %596 = vmatprep.mubr.f32.mxu1 %v2497_v8 }
 0x1c1   : > { %v348_v59 = vpop.trf.xlu0 }
 0x1c2   : > { %1734 = vmatmul.mubr.msk.f32.gmra.mrb[14].mxu1 %vm389_vm2, %v348_v59 }
 0x1c3   : > { %602 = vmatprep.mubr.f32.mxu1 %v2497_v8 }
 0x1c5   : > { %v349_v60 = vpop.trf.xlu0 }
 0x1c6   : > { %1735 = vmatmul.mubr.msk.f32.gmra.mrb[16].mxu1 %vm389_vm2, %v349_v60 }
 0x1c7   : > { %608 = vmatprep.mubr.f32.mxu1 %v2497_v8 }
 0x1c9   : > { %v350_v61 = vpop.trf.xlu0 }
 0x1ca   : > { %1736 = vmatmul.mubr.msk.f32.gmra.mrb[18].mxu1 %vm389_vm2, %v350_v61 }
 0x1cb   : > { %614 = vmatprep.mubr.f32.mxu1 %v2497_v8 }
 0x1cd   : > { %v351_v62 = vpop.trf.xlu0 }
 0x1ce   : > { %1737 = vmatmul.mubr.msk.f32.gmra.mrb[20].mxu1 %vm389_vm2, %v351_v62 }
 0x1cf   : > { %620 = vmatprep.mubr.f32.mxu1 %v2497_v8 }
 0x1d1   : > { %v352_v63 = vpop.trf.xlu0 }
 0x1d2   : > { %1738 = vmatmul.mubr.msk.f32.gmra.mrb[22].mxu1 %vm389_vm2, %v352_v63 }
 0x1d3   : > { %626 = vmatprep.mubr.f32.mxu1 %v2497_v8 }
 0x1d5   : > { %v353_v0 = vpop.trf.xlu0 }
 0x1d6   : > { %1739 = vmatmul.mubr.msk.f32.gmra.mrb[24].mxu1 %vm389_vm2, %v353_v0 }
 0x1d7   : > { %632 = vmatprep.mubr.f32.mxu1 %v2497_v8 }
 0x1d9   : > { %v354_v1 = vpop.trf.xlu0 }
 0x1da   : > { %1740 = vmatmul.mubr.msk.f32.gmra.mrb[26].mxu1 %vm389_vm2, %v354_v1 }
 0x1db   : > { %638 = vmatprep.mubr.f32.mxu1 %v2497_v8 }
 0x1dd   : > { %v355_v2 = vpop.trf.xlu0 }
 0x1de   : > { %1741 = vmatmul.mubr.msk.f32.gmra.mrb[28].mxu1 %vm389_vm2, %v355_v2 }
 0x1df   : > { %644 = vmatprep.mubr.f32.mxu1 %v2497_v8 }
 0x1e1   : > { %v356_v3 = vpop.trf.xlu0 }
 0x1e2   : > { %1742 = vmatmul.mubr.msk.f32.gmra.mrb[30].mxu1 %vm389_vm2, %v356_v3 }
 0x1e3   : > { %650 = vmatprep.mubr.f32.mxu1 %v2497_v8 }
 0x1e5   : > { %v373_v4 = vpop.trf.xlu0 }
 0x1e6   : > { %1743 = vmatmul.mubr.msk.f32.gmra.mrb[32].mxu1 %vm389_vm2, %v373_v4 }
 0x1e7   : > { %656 = vmatprep.mubr.f32.mxu1 %v2497_v8 }
 0x1e9   : > { %v374_v5 = vpop.trf.xlu0 }
 0x1ea   : > { %1744 = vmatmul.mubr.msk.f32.gmra.mrb[34].mxu1 %vm389_vm2, %v374_v5 }
 0x1eb   : > { %662 = vmatprep.mubr.f32.mxu1 %v2497_v8 }
 0x1ed   : > { %v375_v6 = vpop.trf.xlu0 }
 0x1ee   : > { %1745 = vmatmul.mubr.msk.f32.gmra.mrb[36].mxu1 %vm389_vm2, %v375_v6 }
 0x1ef   : > { %668 = vmatprep.mubr.f32.mxu1 %v2497_v8 }
 0x1f1   : > { %v376_v7 = vpop.trf.xlu0 }
 0x1f2   : > { %1746 = vmatmul.mubr.msk.f32.gmra.mrb[38].mxu1 %vm389_vm2, %v376_v7 }
 0x1f3   : > { %674 = vmatprep.mubr.f32.mxu1 %v2497_v8 }
 0x1f5   : > { %v377_v9 = vpop.trf.xlu0 }
 0x1f6   : > { %1747 = vmatmul.mubr.msk.f32.gmra.mrb[40].mxu1 %vm389_vm2, %v377_v9 }
 0x1f7   : > { %680 = vmatprep.mubr.f32.mxu1 %v2497_v8 }
 0x1f9   : > { %v378_v10 = vpop.trf.xlu0 }
 0x1fa   : > { %1748 = vmatmul.mubr.msk.f32.gmra.mrb[42].mxu1 %vm389_vm2, %v378_v10 }
 0x1fb   : > { %686 = vmatprep.mubr.f32.mxu1 %v2497_v8 }
 0x1fd   : > { %v379_v11 = vpop.trf.xlu0 }
 0x1fe   : > { %1749 = vmatmul.mubr.msk.f32.gmra.mrb[44].mxu1 %vm389_vm2, %v379_v11 }
 0x1ff   : > { %692 = vmatprep.mubr.f32.mxu1 %v2497_v8 }
 0x201   : > { %v380_v12 = vpop.trf.xlu0 }
 0x202   : > { %1750 = vmatmul.mubr.msk.f32.gmra.mrb[46].mxu1 %vm389_vm2, %v380_v12 }
 0x203   : > { %698 = vmatprep.mubr.f32.mxu1 %v2497_v8 }
 0x205   : > { %v381_v13 = vpop.trf.xlu0 }
 0x206   : > { %1751 = vmatmul.mubr.msk.f32.gmra.mrb[48].mxu1 %vm389_vm2, %v381_v13 }
 0x207   : > { %704 = vmatprep.mubr.f32.mxu1 %v2497_v8 }
 0x209   : > { %v382_v14 = vpop.trf.xlu0 }
 0x20a   : > { %1752 = vmatmul.mubr.msk.f32.gmra.mrb[50].mxu1 %vm389_vm2, %v382_v14 }
 0x20b   : > { %710 = vmatprep.mubr.f32.mxu1 %v2497_v8 }
 0x20d   : > { %v383_v15 = vpop.trf.xlu0 }
 0x20e   : > { %1753 = vmatmul.mubr.msk.f32.gmra.mrb[52].mxu1 %vm389_vm2, %v383_v15 }
 0x20f   : > { %716 = vmatprep.mubr.f32.mxu1 %v2497_v8 }
 0x211   : > { %v384_v16 = vpop.trf.xlu0 }
 0x212   : > { %1754 = vmatmul.mubr.msk.f32.gmra.mrb[54].mxu1 %vm389_vm2, %v384_v16 }
 0x213   : > { %722 = vmatprep.mubr.f32.mxu1 %v2497_v8 }
 0x215   : > { %v385_v17 = vpop.trf.xlu0 }
 0x216   : > { %1755 = vmatmul.mubr.msk.f32.gmra.mrb[56].mxu1 %vm389_vm2, %v385_v17 }
 0x217   : > { %728 = vmatprep.mubr.f32.mxu1 %v2497_v8 }
 0x219   : > { %v386_v18 = vpop.trf.xlu0 }
 0x21a   : > { %1756 = vmatmul.mubr.msk.f32.gmra.mrb[58].mxu1 %vm389_vm2, %v386_v18 }
 0x21b   : > { %734 = vmatprep.mubr.f32.mxu1 %v2497_v8 }
 0x21d   : > { %v387_v19 = vpop.trf.xlu0 }
 0x21e   : > { %1757 = vmatmul.mubr.msk.f32.gmra.mrb[60].mxu1 %vm389_vm2, %v387_v19 }
 0x21f   : > { %740 = vmatprep.mubr.f32.mxu1 %v2497_v8 }
 0x221   : > { %v388_v20 = vpop.trf.xlu0 }
 0x222   : > { %1758 = vmatmul.mubr.msk.f32.gmra.mrb[62].mxu1 %vm389_vm2, %v388_v20 }
 0x223   : > { %1584 = vmatprep.mubr.f32.mxu1 %v2497_v8 }
 0x279   : > { %v2172_v21 = vpop.f32.mrb[0].mxu1 }
 0x27a   : > { %v2174_v22 = vpop.f32.mrb[1].mxu1 }
 0x27b   : > { %v747_v23 = vmax.f32 %v2172_v21, %v2174_v22 }
 0x27d   : > { %748 = vmax.xlane.f32.xlu1 %v747_v23  ;;  %v2178_v24 = vpop.f32.mrb[2].mxu1 }
 0x27e   : > { %v2180_v25 = vpop.f32.mrb[3].mxu1 }
 0x27f   : > { %v750_v26 = vmax.f32 %v2178_v24, %v2180_v25 }
 0x281   : > { %751 = vmax.xlane.f32.xlu1 %v750_v26  ;;  %v2184_v27 = vpop.f32.mrb[4].mxu1 }
 0x282   : > { %v2186_v28 = vpop.f32.mrb[5].mxu1 }
 0x283   : > { %v753_v29 = vmax.f32 %v2184_v27, %v2186_v28 }
 0x285   : > { %754 = vmax.xlane.f32.xlu1 %v753_v29  ;;  %v2190_v30 = vpop.f32.mrb[6].mxu1 }
 0x286   : > { %v2192_v31 = vpop.f32.mrb[7].mxu1 }
 0x287   : > { %v756_v32 = vmax.f32 %v2190_v30, %v2192_v31 }
 0x289   : > { %757 = vmax.xlane.f32.xlu1 %v756_v32  ;;  %v2196_v33 = vpop.f32.mrb[8].mxu1 }
 0x28a   : > { %v2198_v34 = vpop.f32.mrb[9].mxu1 }
 0x28b   : > { %v759_v35 = vmax.f32 %v2196_v33, %v2198_v34 }
 0x28d   : > { %760 = vmax.xlane.f32.xlu1 %v759_v35  ;;  %v2202_v36 = vpop.f32.mrb[10].mxu1 }
 0x28e   : > { %v2204_v37 = vpop.f32.mrb[11].mxu1 }
 0x28f   : > { %v762_v38 = vmax.f32 %v2202_v36, %v2204_v37 }
 0x291   : > { %763 = vmax.xlane.f32.xlu1 %v762_v38  ;;  %v2208_v39 = vpop.f32.mrb[12].mxu1 }
 0x292   : > { %v2210_v40 = vpop.f32.mrb[13].mxu1 }
 0x293   : > { %v765_v41 = vmax.f32 %v2208_v39, %v2210_v40 }
 0x295   : > { %766 = vmax.xlane.f32.xlu1 %v765_v41  ;;  %v2214_v42 = vpop.f32.mrb[14].mxu1 }
 0x296   : > { %v2216_v43 = vpop.f32.mrb[15].mxu1 }
 0x297   : > { %v768_v44 = vmax.f32 %v2214_v42, %v2216_v43 }
 0x299   : > { %769 = vmax.xlane.f32.xlu1 %v768_v44  ;;  %v2220_v45 = vpop.f32.mrb[16].mxu1 }
 0x29a   : > { %v2222_v46 = vpop.f32.mrb[17].mxu1 }
 0x29b   : > { %v771_v47 = vmax.f32 %v2220_v45, %v2222_v46 }
 0x29d   : > { %772 = vmax.xlane.f32.xlu1 %v771_v47  ;;  %v2226_v48 = vpop.f32.mrb[18].mxu1 }
 0x29e   : > { %v2228_v49 = vpop.f32.mrb[19].mxu1 }
 0x29f   : > { %v774_v50 = vmax.f32 %v2226_v48, %v2228_v49 }
 0x2a1   : > { %775 = vmax.xlane.f32.xlu1 %v774_v50  ;;  %v2232_v51 = vpop.f32.mrb[20].mxu1 }
 0x2a2   : > { %v2234_v52 = vpop.f32.mrb[21].mxu1 }
 0x2a3   : > { %v777_v53 = vmax.f32 %v2232_v51, %v2234_v52 }
 0x2a5   : > { %778 = vmax.xlane.f32.xlu1 %v777_v53  ;;  %v2238_v54 = vpop.f32.mrb[22].mxu1 }
 0x2a6   : > { %v2240_v55 = vpop.f32.mrb[23].mxu1 }
 0x2a7   : > { %v780_v56 = vmax.f32 %v2238_v54, %v2240_v55 }
 0x2a9   : > { %781 = vmax.xlane.f32.xlu1 %v780_v56  ;;  %v2244_v57 = vpop.f32.mrb[24].mxu1 }
 0x2aa   : > { %v2246_v58 = vpop.f32.mrb[25].mxu1 }
 0x2ab   : > { %v783_v59 = vmax.f32 %v2244_v57, %v2246_v58 }
 0x2ad   : > { %784 = vmax.xlane.f32.xlu1 %v783_v59  ;;  %v2250_v60 = vpop.f32.mrb[26].mxu1 }
 0x2ae   : > { %v2252_v61 = vpop.f32.mrb[27].mxu1 }
 0x2af   : > { %v786_v62 = vmax.f32 %v2250_v60, %v2252_v61 }
 0x2b1   : > { %787 = vmax.xlane.f32.xlu1 %v786_v62  ;;  %v2256_v63 = vpop.f32.mrb[28].mxu1 }
 0x2b2   : > { %v2258_v0 = vpop.f32.mrb[29].mxu1 }
 0x2b3   : > { %v789_v1 = vmax.f32 %v2256_v63, %v2258_v0 }
 0x2b5   : > { %790 = vmax.xlane.f32.xlu1 %v789_v1  ;;  %v2262_v2 = vpop.f32.mrb[30].mxu1 }
 0x2b6   : > { %v2264_v3 = vpop.f32.mrb[31].mxu1 }
 0x2b7   : > { %v792_v4 = vmax.f32 %v2262_v2, %v2264_v3 }
 0x2b9   : > { %793 = vmax.xlane.f32.xlu1 %v792_v4  ;;  %v2268_v5 = vpop.f32.mrb[32].mxu1 }
 0x2ba   : > { %v2270_v6 = vpop.f32.mrb[33].mxu1 }
 0x2bb   : > { %v795_v7 = vmax.f32 %v2268_v5, %v2270_v6 }
 0x2bd   : > { %796 = vmax.xlane.f32.xlu1 %v795_v7  ;;  %v2274_v9 = vpop.f32.mrb[34].mxu1 }
 0x2be   : > { %v2276_v10 = vpop.f32.mrb[35].mxu1 }
 0x2bf   : > { %v798_v11 = vmax.f32 %v2274_v9, %v2276_v10 }
 0x2c1   : > { %799 = vmax.xlane.f32.xlu0 %v798_v11  ;;  %v2280_v12 = vpop.f32.mrb[36].mxu1 }
 0x2c2   : > { %v2282_v13 = vpop.f32.mrb[37].mxu1 }
 0x2c3   : > { %v801_v14 = vmax.f32 %v2280_v12, %v2282_v13 }
 0x2c5   : > { %802 = vmax.xlane.f32.xlu1 %v801_v14  ;;  %v2286_v15 = vpop.f32.mrb[38].mxu1 }
 0x2c6   : > { %v2288_v16 = vpop.f32.mrb[39].mxu1 }
 0x2c7   : > { %v804_v17 = vmax.f32 %v2286_v15, %v2288_v16 }
 0x2c9   : > { %805 = vmax.xlane.f32.xlu1 %v804_v17  ;;  %v2292_v18 = vpop.f32.mrb[40].mxu1 }
 0x2ca   : > { %v2294_v19 = vpop.f32.mrb[41].mxu1 }
 0x2cb   : > { %v807_v20 = vmax.f32 %v2292_v18, %v2294_v19 }
 0x2cd   : > { %808 = vmax.xlane.f32.xlu1 %v807_v20  ;;  %v2298_v23 = vpop.f32.mrb[42].mxu1 }
 0x2ce   : > { %v2300_v26 = vpop.f32.mrb[43].mxu1 }
 0x2cf   : > { %v810_v29 = vmax.f32 %v2298_v23, %v2300_v26 }
 0x2d1   : > { %811 = vmax.xlane.f32.xlu1 %v810_v29  ;;  %v2304_v32 = vpop.f32.mrb[44].mxu1 }
 0x2d2   : > { %v2306_v35 = vpop.f32.mrb[45].mxu1 }
 0x2d3   : > { %v813_v38 = vmax.f32 %v2304_v32, %v2306_v35 }
 0x2d5   : > { %814 = vmax.xlane.f32.xlu1 %v813_v38  ;;  %v2310_v41 = vpop.f32.mrb[46].mxu1 }
 0x2d6   : > { %v2312_v44 = vpop.f32.mrb[47].mxu1 }
 0x2d7   : > { %v816_v47 = vmax.f32 %v2310_v41, %v2312_v44 }
 0x2d9   : > { %817 = vmax.xlane.f32.xlu1 %v816_v47  ;;  %v2316_v50 = vpop.f32.mrb[48].mxu1 }
 0x2da   : > { %v2318_v53 = vpop.f32.mrb[49].mxu1 }
 0x2db   : > { %v819_v56 = vmax.f32 %v2316_v50, %v2318_v53 }
 0x2dd   : > { %820 = vmax.xlane.f32.xlu1 %v819_v56  ;;  %v2322_v59 = vpop.f32.mrb[50].mxu1 }
 0x2de   : > { %2513 = vst [vmem:[#allocation6_spill] sm:$0xff] %v2322_v59  ;;  %v2324_v62 = vpop.f32.mrb[51].mxu1 }
 0x2df   : > { %2514 = vst [vmem:[#allocation7_spill] sm:$0xff] %v2324_v62  ;;  %v822_v1 = vmax.f32 %v2322_v59, %v2324_v62 }
 0x2e1   : > { %823 = vmax.xlane.f32.xlu1 %v822_v1  ;;  %v2328_v4 = vpop.f32.mrb[52].mxu1 }
 0x2e2   : > { %2515 = vst [vmem:[#allocation8_spill] sm:$0xff] %v2328_v4  ;;  %v2330_v7 = vpop.f32.mrb[53].mxu1 }
 0x2e3   : > { %2516 = vst [vmem:[#allocation9_spill] sm:$0xff] %v2330_v7  ;;  %v825_v11 = vmax.f32 %v2328_v4, %v2330_v7 }
 0x2e5   : > { %826 = vmax.xlane.f32.xlu1 %v825_v11  ;;  %v2334_v14 = vpop.f32.mrb[54].mxu1 }
 0x2e6   : > { %2517 = vst [vmem:[#allocation10_spill] sm:$0xff] %v2334_v14  ;;  %v2336_v17 = vpop.f32.mrb[55].mxu1 }
 0x2e7   : > { %2518 = vst [vmem:[#allocation11_spill] sm:$0xff] %v2336_v17  ;;  %v828_v20 = vmax.f32 %v2334_v14, %v2336_v17 }
 0x2e9   : > { %829 = vmax.xlane.f32.xlu1 %v828_v20  ;;  %v2340_v29 = vpop.f32.mrb[56].mxu1 }
 0x2ea   : > { %2519 = vst [vmem:[#allocation12_spill] sm:$0xff] %v2340_v29  ;;  %v2342_v38 = vpop.f32.mrb[57].mxu1 }
 0x2eb   : > { %2520 = vst [vmem:[#allocation13_spill] sm:$0xff] %v2342_v38  ;;  %v831_v47 = vmax.f32 %v2340_v29, %v2342_v38 }
 0x2ed   : > { %832 = vmax.xlane.f32.xlu1 %v831_v47  ;;  %v2346_v56 = vpop.f32.mrb[58].mxu1 }
 0x2ee   : > { %2521 = vst [vmem:[#allocation14_spill] sm:$0xff] %v2346_v56  ;;  %v2348_v1 = vpop.f32.mrb[59].mxu1 }
 0x2ef   : > { %2522 = vst [vmem:[#allocation15_spill] sm:$0xff] %v2348_v1  ;;  %v834_v11 = vmax.f32 %v2346_v56, %v2348_v1 }
 0x2f1   : > { %835 = vmax.xlane.f32.xlu1 %v834_v11  ;;  %v2352_v8 = vpop.f32.mrb[60].mxu1 }
 0x2f2   : > { %2523 = vst [vmem:[#allocation16_spill] sm:$0xff] %v2352_v8  ;;  %v2354_v17 = vpop.f32.mrb[61].mxu1 }
 0x2f3   : > { %2524 = vst [vmem:[#allocation17_spill] sm:$0xff] %v2354_v17  ;;  %v837_v20 = vmax.f32 %v2352_v8, %v2354_v17 }
 0x2f5   : > { %838 = vmax.xlane.f32.xlu1 %v837_v20  ;;  %v2358_v14 = vpop.f32.mrb[62].mxu1 }
 0x2f6   : > { %v2360_v38 = vpop.f32.mrb[63].mxu1 }
 0x2f7   : > { %2525 = vst [vmem:[#allocation18_spill] sm:$0xff] %v2360_v38  ;;  %v840_v47 = vmax.f32 %v2358_v14, %v2360_v38 }
 0x2f9   : > { %841 = vmax.xlane.f32.xlu1 %v840_v47 }
 0x30a   : > { %v749_v29 = vpop.xlane.xlu1 %748 }
 0x30b   : > { %v843_v1 = vsub.f32 %v2172_v21, %v749_v29  ;;  %v844_v11 = vsub.f32 %v2174_v22, %v749_v29 }
 0x30d   : > { %v907_v56 = vmul.f32 1.442695, %v843_v1  ;;  %v909_v7 = vmul.f32 1.442695, %v844_v11 }
 0x30e   : > { %v752_v4 = vpop.xlane.xlu1 %751 }
 0x30f   : > { %1806 = vpow2.f32 %v907_v56  ;;  %v845_v17 = vsub.f32 %v2178_v24, %v752_v4  ;;  %v846_v20 = vsub.f32 %v2180_v25, %v752_v4 }
 0x310   : > { %1808 = vpow2.f32 %v909_v7 }
 0x311   : > { %v911_v8 = vmul.f32 1.442695, %v845_v17  ;;  %v913_v62 = vmul.f32 1.442695, %v846_v20 }
 0x312   : > { %v755_v59 = vpop.xlane.xlu1 %754 }
 0x313   : > { %1810 = vpow2.f32 %v911_v8  ;;  %v847_v47 = vsub.f32 %v2184_v27, %v755_v59  ;;  %v848_v38 = vsub.f32 %v2186_v28, %v755_v59 }
 0x314   : > { %1812 = vpow2.f32 %v913_v62 }
 0x315   : > { %v915_v21 = vmul.f32 1.442695, %v847_v47  ;;  %v917_v22 = vmul.f32 1.442695, %v848_v38 }
 0x316   : > { %v758_v29 = vpop.xlane.xlu1 %757 }
 0x317   : > { %1814 = vpow2.f32 %v915_v21  ;;  %v849_v56 = vsub.f32 %v2190_v30, %v758_v29  ;;  %v850_v24 = vsub.f32 %v2192_v31, %v758_v29 }
 0x318   : > { %1816 = vpow2.f32 %v917_v22 }
 0x319   : > { %v1807_v25 = vpop.eup %1806  ;;  %v919_v4 = vmul.f32 1.442695, %v849_v56  ;;  %v921_v7 = vmul.f32 1.442695, %v850_v24 }
 0x31a   : > { %v1809_v17 = vpop.eup %1808  ;;  %v761_v1 = vpop.xlane.xlu1 %760 }
 0x31b   : > { %1818 = vpow2.f32 %v919_v4  ;;  %1195 = vmatprep.mubr.f32.mxu0 %v1809_v17  ;;  %v851_v8 = vsub.f32 %v2196_v33, %v761_v1  ;;  %v852_v27 = vsub.f32 %v2198_v34, %v761_v1  ;;  %v1035_v28 = vadd.f32 %v1809_v17, %v1807_v25 }
 0x31c   : > { %1820 = vpow2.f32 %v921_v7  ;;  %1196 = vmatmul.mubr.f32.vlgmr.msra.gmra.mrb[2].mxu0 %v1807_v25 }
 0x31d   : > { %v1811_v59 = vpop.eup %1810  ;;  %v923_v62 = vmul.f32 1.442695, %v851_v8  ;;  %v925_v30 = vmul.f32 1.442695, %v852_v27  ;;  %1036 = vadd.xlane.f32.xlu1 %v1035_v28 }
 0x31e   : > { %v1813_v31 = vpop.eup %1812  ;;  %v764_v38 = vpop.xlane.xlu1 %763 }
 0x31f   : > { %1822 = vpow2.f32 %v923_v62  ;;  %v853_v11 = vsub.f32 %v2202_v36, %v764_v38  ;;  %v854_v20 = vsub.f32 %v2204_v37, %v764_v38  ;;  %1200 = vmatprep.mubr.f32.mxu0 %v1813_v31  ;;  %v1038_v47 = vadd.f32 %v1813_v31, %v1811_v59 }
 0x320   : > { %1824 = vpow2.f32 %v925_v30  ;;  %1201 = vmatmul.mubr.f32.gmra.mrb[4].mxu0 %v1811_v59 }
 0x321   : > { %v1815_v33 = vpop.eup %1814  ;;  %v927_v34 = vmul.f32 1.442695, %v853_v11  ;;  %v929_v21 = vmul.f32 1.442695, %v854_v20  ;;  %1039 = vadd.xlane.f32.xlu1 %v1038_v47 }
 0x322   : > { %v1817_v22 = vpop.eup %1816  ;;  %v767_v29 = vpop.xlane.xlu1 %766 }
 0x323   : > { %1826 = vpow2.f32 %v927_v34  ;;  %v855_v56 = vsub.f32 %v2208_v39, %v767_v29  ;;  %v856_v24 = vsub.f32 %v2210_v40, %v767_v29  ;;  %1205 = vmatprep.mubr.f32.mxu0 %v1817_v22  ;;  %v1041_v25 = vadd.f32 %v1817_v22, %v1815_v33 }
 0x324   : > { %1828 = vpow2.f32 %v929_v21  ;;  %1206 = vmatmul.mubr.f32.gmra.mrb[6].mxu0 %v1815_v33 }
 0x325   : > { %v1819_v36 = vpop.eup %1818  ;;  %v931_v37 = vmul.f32 1.442695, %v855_v56  ;;  %v933_v4 = vmul.f32 1.442695, %v856_v24  ;;  %1042 = vadd.xlane.f32.xlu1 %v1041_v25 }
 0x326   : > { %v1821_v7 = vpop.eup %1820  ;;  %v770_v17 = vpop.xlane.xlu1 %769 }
 0x327   : > { %1830 = vpow2.f32 %v931_v37  ;;  %v857_v1 = vsub.f32 %v2214_v42, %v770_v17  ;;  %v858_v8 = vsub.f32 %v2216_v43, %v770_v17  ;;  %1210 = vmatprep.mubr.f32.mxu0 %v1821_v7  ;;  %v1044_v27 = vadd.f32 %v1821_v7, %v1819_v36 }
 0x328   : > { %1832 = vpow2.f32 %v933_v4  ;;  %1211 = vmatmul.mubr.f32.gmra.mrb[8].mxu0 %v1819_v36 }
 0x329   : > { %v1823_v39 = vpop.eup %1822  ;;  %v935_v40 = vmul.f32 1.442695, %v857_v1  ;;  %v937_v28 = vmul.f32 1.442695, %v858_v8  ;;  %1045 = vadd.xlane.f32.xlu1 %v1044_v27 }
 0x32a   : > { %v1825_v59 = vpop.eup %1824  ;;  %v773_v62 = vpop.xlane.xlu1 %772 }
 0x32b   : > { %1834 = vpow2.f32 %v935_v40  ;;  %v859_v30 = vsub.f32 %v2220_v45, %v773_v62  ;;  %v860_v31 = vsub.f32 %v2222_v46, %v773_v62  ;;  %1215 = vmatprep.mubr.f32.mxu0 %v1825_v59  ;;  %v1047_v38 = vadd.f32 %v1825_v59, %v1823_v39 }
 0x32c   : > { %1836 = vpow2.f32 %v937_v28  ;;  %1216 = vmatmul.mubr.f32.gmra.mrb[10].mxu0 %v1823_v39 }
 0x32d   : > { %v1827_v42 = vpop.eup %1826  ;;  %v939_v43 = vmul.f32 1.442695, %v859_v30  ;;  %v941_v11 = vmul.f32 1.442695, %v860_v31  ;;  %1048 = vadd.xlane.f32.xlu1 %v1047_v38 }
 0x32e   : > { %v1829_v20 = vpop.eup %1828  ;;  %v776_v47 = vpop.xlane.xlu1 %775 }
 0x32f   : > { %1838 = vpow2.f32 %v939_v43  ;;  %v861_v33 = vsub.f32 %v2226_v48, %v776_v47  ;;  %v862_v34 = vsub.f32 %v2228_v49, %v776_v47  ;;  %1220 = vmatprep.mubr.f32.mxu0 %v1829_v20  ;;  %v1050_v21 = vadd.f32 %v1829_v20, %v1827_v42 }
 0x330   : > { %1840 = vpow2.f32 %v941_v11  ;;  %1221 = vmatmul.mubr.f32.gmra.mrb[12].mxu0 %v1827_v42 }
 0x331   : > { %v1831_v45 = vpop.eup %1830  ;;  %v943_v46 = vmul.f32 1.442695, %v861_v33  ;;  %v945_v22 = vmul.f32 1.442695, %v862_v34  ;;  %1051 = vadd.xlane.f32.xlu1 %v1050_v21 }
 0x332   : > { %v1833_v29 = vpop.eup %1832  ;;  %v779_v56 = vpop.xlane.xlu1 %778 }
 0x333   : > { %1842 = vpow2.f32 %v943_v46  ;;  %v863_v24 = vsub.f32 %v2232_v51, %v779_v56  ;;  %v864_v25 = vsub.f32 %v2234_v52, %v779_v56  ;;  %1225 = vmatprep.mubr.f32.mxu0 %v1833_v29  ;;  %v1053_v36 = vadd.f32 %v1833_v29, %v1831_v45 }
 0x334   : > { %1844 = vpow2.f32 %v945_v22  ;;  %1226 = vmatmul.mubr.f32.gmra.mrb[14].mxu0 %v1831_v45 }
 0x335   : > { %v1835_v48 = vpop.eup %1834  ;;  %v947_v49 = vmul.f32 1.442695, %v863_v24  ;;  %v949_v37 = vmul.f32 1.442695, %v864_v25  ;;  %1054 = vadd.xlane.f32.xlu1 %v1053_v36 }
 0x336   : > { %v1837_v4 = vpop.eup %1836  ;;  %v782_v7 = vpop.xlane.xlu1 %781 }
 0x337   : > { %1846 = vpow2.f32 %v947_v49  ;;  %v865_v17 = vsub.f32 %v2238_v54, %v782_v7  ;;  %v866_v1 = vsub.f32 %v2240_v55, %v782_v7  ;;  %1230 = vmatprep.mubr.f32.mxu0 %v1837_v4  ;;  %v1056_v8 = vadd.f32 %v1837_v4, %v1835_v48 }
 0x338   : > { %1848 = vpow2.f32 %v949_v37  ;;  %1231 = vmatmul.mubr.f32.gmra.mrb[16].mxu0 %v1835_v48 }
 0x339   : > { %v1839_v51 = vpop.eup %1838  ;;  %v951_v52 = vmul.f32 1.442695, %v865_v17  ;;  %v953_v27 = vmul.f32 1.442695, %v866_v1  ;;  %1057 = vadd.xlane.f32.xlu1 %v1056_v8 }
 0x33a   : > { %v1841_v39 = vpop.eup %1840  ;;  %v785_v40 = vpop.xlane.xlu1 %784 }
 0x33b   : > { %1850 = vpow2.f32 %v951_v52  ;;  %v867_v28 = vsub.f32 %v2244_v57, %v785_v40  ;;  %v868_v59 = vsub.f32 %v2246_v58, %v785_v40  ;;  %1235 = vmatprep.mubr.f32.mxu0 %v1841_v39  ;;  %v1059_v62 = vadd.f32 %v1841_v39, %v1839_v51 }
 0x33c   : > { %1852 = vpow2.f32 %v953_v27  ;;  %1236 = vmatmul.mubr.f32.gmra.mrb[18].mxu0 %v1839_v51 }
 0x33d   : > { %v1843_v54 = vpop.eup %1842  ;;  %v955_v55 = vmul.f32 1.442695, %v867_v28  ;;  %v957_v30 = vmul.f32 1.442695, %v868_v59  ;;  %1060 = vadd.xlane.f32.xlu1 %v1059_v62 }
 0x33e   : > { %v1845_v31 = vpop.eup %1844  ;;  %v788_v38 = vpop.xlane.xlu1 %787 }
 0x33f   : > { %1854 = vpow2.f32 %v955_v55  ;;  %v869_v42 = vsub.f32 %v2250_v60, %v788_v38  ;;  %v870_v43 = vsub.f32 %v2252_v61, %v788_v38  ;;  %1240 = vmatprep.mubr.f32.mxu0 %v1845_v31  ;;  %v1062_v11 = vadd.f32 %v1845_v31, %v1843_v54 }
 0x340   : > { %1856 = vpow2.f32 %v957_v30  ;;  %1241 = vmatmul.mubr.f32.gmra.mrb[20].mxu0 %v1843_v54 }
 0x341   : > { %v1847_v57 = vpop.eup %1846  ;;  %v959_v58 = vmul.f32 1.442695, %v869_v42  ;;  %v961_v20 = vmul.f32 1.442695, %v870_v43  ;;  %1063 = vadd.xlane.f32.xlu1 %v1062_v11 }
 0x342   : > { %v1849_v47 = vpop.eup %1848  ;;  %v791_v33 = vpop.xlane.xlu1 %790 }
 0x343   : > { %1858 = vpow2.f32 %v959_v58  ;;  %v871_v34 = vsub.f32 %v2256_v63, %v791_v33  ;;  %v872_v21 = vsub.f32 %v2258_v0, %v791_v33  ;;  %1245 = vmatprep.mubr.f32.mxu0 %v1849_v47  ;;  %v1065_v45 = vadd.f32 %v1849_v47, %v1847_v57 }
 0x344   : > { %1860 = vpow2.f32 %v961_v20  ;;  %1246 = vmatmul.mubr.f32.gmra.mrb[22].mxu0 %v1847_v57 }
 0x345   : > { %v1851_v60 = vpop.eup %1850  ;;  %v963_v61 = vmul.f32 1.442695, %v871_v34  ;;  %v965_v46 = vmul.f32 1.442695, %v872_v21  ;;  %1066 = vadd.xlane.f32.xlu1 %v1065_v45 }
 0x346   : > { %v1853_v22 = vpop.eup %1852  ;;  %v794_v29 = vpop.xlane.xlu1 %793 }
 0x347   : > { %1862 = vpow2.f32 %v963_v61  ;;  %v873_v56 = vsub.f32 %v2262_v2, %v794_v29  ;;  %v874_v24 = vsub.f32 %v2264_v3, %v794_v29  ;;  %1250 = vmatprep.mubr.f32.mxu0 %v1853_v22  ;;  %v1068_v25 = vadd.f32 %v1853_v22, %v1851_v60 }
 0x348   : > { %1864 = vpow2.f32 %v965_v46  ;;  %1251 = vmatmul.mubr.f32.gmra.mrb[24].mxu0 %v1851_v60 }
 0x349   : > { %v1855_v63 = vpop.eup %1854  ;;  %v967_v0 = vmul.f32 1.442695, %v873_v56  ;;  %v969_v36 = vmul.f32 1.442695, %v874_v24  ;;  %1069 = vadd.xlane.f32.xlu1 %v1068_v25 }
 0x34a   : > { %v1857_v48 = vpop.eup %1856  ;;  %v797_v49 = vpop.xlane.xlu1 %796 }
 0x34b   : > { %1866 = vpow2.f32 %v967_v0  ;;  %v875_v37 = vsub.f32 %v2268_v5, %v797_v49  ;;  %v876_v4 = vsub.f32 %v2270_v6, %v797_v49  ;;  %1255 = vmatprep.mubr.f32.mxu0 %v1857_v48  ;;  %v1071_v7 = vadd.f32 %v1857_v48, %v1855_v63 }
 0x34c   : > { %1868 = vpow2.f32 %v969_v36  ;;  %1256 = vmatmul.mubr.f32.gmra.mrb[26].mxu0 %v1855_v63 }
 0x34d   : > { %v1859_v2 = vpop.eup %1858  ;;  %v971_v3 = vmul.f32 1.442695, %v875_v37  ;;  %v973_v17 = vmul.f32 1.442695, %v876_v4  ;;  %1072 = vadd.xlane.f32.xlu1 %v1071_v7 }
 0x34e   : > { %v1861_v1 = vpop.eup %1860  ;;  %v800_v8 = vpop.xlane.xlu0 %799 }
 0x34f   : > { %1870 = vpow2.f32 %v971_v3  ;;  %v877_v51 = vsub.f32 %v2274_v9, %v800_v8  ;;  %v878_v52 = vsub.f32 %v2276_v10, %v800_v8  ;;  %1260 = vmatprep.mubr.f32.mxu0 %v1861_v1  ;;  %v1074_v27 = vadd.f32 %v1861_v1, %v1859_v2 }
 0x350   : > { %1872 = vpow2.f32 %v973_v17  ;;  %1261 = vmatmul.mubr.f32.gmra.mrb[28].mxu0 %v1859_v2 }
 0x351   : > { %v1863_v5 = vpop.eup %1862  ;;  %v975_v6 = vmul.f32 1.442695, %v877_v51  ;;  %v977_v39 = vmul.f32 1.442695, %v878_v52  ;;  %1075 = vadd.xlane.f32.xlu1 %v1074_v27 }
 0x352   : > { %v1865_v40 = vpop.eup %1864  ;;  %v803_v28 = vpop.xlane.xlu1 %802 }
 0x353   : > { %1874 = vpow2.f32 %v975_v6  ;;  %v879_v59 = vsub.f32 %v2280_v12, %v803_v28  ;;  %v880_v62 = vsub.f32 %v2282_v13, %v803_v28  ;;  %1265 = vmatprep.mubr.f32.mxu0 %v1865_v40  ;;  %v1077_v54 = vadd.f32 %v1865_v40, %v1863_v5 }
 0x354   : > { %1876 = vpow2.f32 %v977_v39  ;;  %1266 = vmatmul.mubr.f32.gmra.mrb[30].mxu0 %v1863_v5  ;;  %v2526_v5 = vld [vmem:[#allocation6_spill] sm:$0xff]  ;;  %v2527_v39 = vld [vmem:[#allocation7_spill] sm:$0xff] }
 0x355   : > { %v1867_v9 = vpop.eup %1866  ;;  %v979_v10 = vmul.f32 1.442695, %v879_v59  ;;  %v981_v55 = vmul.f32 1.442695, %v880_v62  ;;  %1078 = vadd.xlane.f32.xlu1 %v1077_v54 }
 0x356   : > { %v1869_v30 = vpop.eup %1868  ;;  %v806_v31 = vpop.xlane.xlu1 %805 }
 0x357   : > { %1878 = vpow2.f32 %v979_v10  ;;  %v881_v38 = vsub.f32 %v2286_v15, %v806_v31  ;;  %v882_v42 = vsub.f32 %v2288_v16, %v806_v31  ;;  %1270 = vmatprep.mubr.f32.mxu0 %v1869_v30  ;;  %v1080_v43 = vadd.f32 %v1869_v30, %v1867_v9 }
 0x358   : > { %1880 = vpow2.f32 %v981_v55  ;;  %1271 = vmatmul.mubr.f32.gmra.mrb[32].mxu0 %v1867_v9  ;;  %v2528_v9 = vld [vmem:[#allocation8_spill] sm:$0xff]  ;;  %v2529_v55 = vld [vmem:[#allocation9_spill] sm:$0xff] }
 0x359   : > { %v1871_v12 = vpop.eup %1870  ;;  %v983_v13 = vmul.f32 1.442695, %v881_v38  ;;  %v985_v11 = vmul.f32 1.442695, %v882_v42  ;;  %1081 = vadd.xlane.f32.xlu1 %v1080_v43 }
 0x35a   : > { %v1873_v57 = vpop.eup %1872  ;;  %v809_v58 = vpop.xlane.xlu1 %808 }
 0x35b   : > { %1882 = vpow2.f32 %v983_v13  ;;  %v883_v20 = vsub.f32 %v2292_v18, %v809_v58  ;;  %v884_v47 = vsub.f32 %v2294_v19, %v809_v58  ;;  %1275 = vmatprep.mubr.f32.mxu0 %v1873_v57  ;;  %v1083_v33 = vadd.f32 %v1873_v57, %v1871_v12  ;;  %v2531_v58 = vld [vmem:[#allocation11_spill] sm:$0xff] }
 0x35c   : > { %1884 = vpow2.f32 %v985_v11  ;;  %1276 = vmatmul.mubr.f32.gmra.mrb[34].mxu0 %v1871_v12  ;;  %v2530_v11 = vld [vmem:[#allocation10_spill] sm:$0xff] }
 0x35d   : > { %v1875_v15 = vpop.eup %1874  ;;  %v987_v16 = vmul.f32 1.442695, %v883_v20  ;;  %v989_v34 = vmul.f32 1.442695, %v884_v47  ;;  %1084 = vadd.xlane.f32.xlu1 %v1083_v33 }
 0x35e   : > { %v1877_v21 = vpop.eup %1876  ;;  %v812_v45 = vpop.xlane.xlu1 %811 }
 0x35f   : > { %1886 = vpow2.f32 %v987_v16  ;;  %v885_v60 = vsub.f32 %v2298_v23, %v812_v45  ;;  %v886_v61 = vsub.f32 %v2300_v26, %v812_v45  ;;  %1280 = vmatprep.mubr.f32.mxu0 %v1877_v21  ;;  %v1086_v46 = vadd.f32 %v1877_v21, %v1875_v15  ;;  %v2532_v45 = vld [vmem:[#allocation12_spill] sm:$0xff] }
 0x360   : > { %1888 = vpow2.f32 %v989_v34  ;;  %1281 = vmatmul.mubr.f32.gmra.mrb[36].mxu0 %v1875_v15 }
 0x361   : > { %v1879_v18 = vpop.eup %1878  ;;  %v991_v19 = vmul.f32 1.442695, %v885_v60  ;;  %v993_v22 = vmul.f32 1.442695, %v886_v61  ;;  %1087 = vadd.xlane.f32.xlu1 %v1086_v46  ;;  %v2533_v61 = vld [vmem:[#allocation13_spill] sm:$0xff] }
 0x362   : > { %v1881_v29 = vpop.eup %1880  ;;  %v815_v56 = vpop.xlane.xlu1 %814 }
 0x363   : > { %1890 = vpow2.f32 %v991_v19  ;;  %v887_v24 = vsub.f32 %v2304_v32, %v815_v56  ;;  %v888_v25 = vsub.f32 %v2306_v35, %v815_v56  ;;  %1285 = vmatprep.mubr.f32.mxu0 %v1881_v29  ;;  %v1089_v63 = vadd.f32 %v1881_v29, %v1879_v18 }
 0x364   : > { %1892 = vpow2.f32 %v993_v22  ;;  %1286 = vmatmul.mubr.f32.gmra.mrb[38].mxu0 %v1879_v18 }
 0x365   : > { %v1883_v23 = vpop.eup %1882  ;;  %v995_v26 = vmul.f32 1.442695, %v887_v24  ;;  %v997_v0 = vmul.f32 1.442695, %v888_v25  ;;  %1090 = vadd.xlane.f32.xlu1 %v1089_v63  ;;  %v2534_v25 = vld [vmem:[#allocation14_spill] sm:$0xff] }
 0x366   : > { %v1885_v36 = vpop.eup %1884  ;;  %v818_v48 = vpop.xlane.xlu1 %817 }
 0x367   : > { %1894 = vpow2.f32 %v995_v26  ;;  %v889_v49 = vsub.f32 %v2310_v41, %v818_v48  ;;  %v890_v37 = vsub.f32 %v2312_v44, %v818_v48  ;;  %1290 = vmatprep.mubr.f32.mxu0 %v1885_v36  ;;  %v1092_v4 = vadd.f32 %v1885_v36, %v1883_v23 }
 0x368   : > { %1896 = vpow2.f32 %v997_v0  ;;  %1291 = vmatmul.mubr.f32.gmra.mrb[40].mxu0 %v1883_v23  ;;  %v2535_v23 = vld [vmem:[#allocation15_spill] sm:$0xff] }
 0x369   : > { %v1887_v32 = vpop.eup %1886  ;;  %v999_v35 = vmul.f32 1.442695, %v889_v49  ;;  %v1001_v7 = vmul.f32 1.442695, %v890_v37  ;;  %1093 = vadd.xlane.f32.xlu1 %v1092_v4 }
 0x36a   : > { %v1889_v2 = vpop.eup %1888  ;;  %v821_v3 = vpop.xlane.xlu1 %820 }
 0x36b   : > { %1898 = vpow2.f32 %v999_v35  ;;  %v891_v17 = vsub.f32 %v2316_v50, %v821_v3  ;;  %v892_v1 = vsub.f32 %v2318_v53, %v821_v3  ;;  %1295 = vmatprep.mubr.f32.mxu0 %v1889_v2  ;;  %v1095_v8 = vadd.f32 %v1889_v2, %v1887_v32 }
 0x36c   : > { %1900 = vpow2.f32 %v1001_v7  ;;  %1296 = vmatmul.mubr.f32.gmra.mrb[42].mxu0 %v1887_v32  ;;  %v2536_v32 = vld [vmem:[#allocation16_spill] sm:$0xff]  ;;  %v2537_v7 = vld [vmem:[#allocation17_spill] sm:$0xff] }
 0x36d   : > { %v1891_v41 = vpop.eup %1890  ;;  %v1003_v44 = vmul.f32 1.442695, %v891_v17  ;;  %v1005_v51 = vmul.f32 1.442695, %v892_v1  ;;  %1096 = vadd.xlane.f32.xlu1 %v1095_v8 }
 0x36e   : > { %v1893_v52 = vpop.eup %1892  ;;  %v824_v27 = vpop.xlane.xlu1 %823 }
 0x36f   : > { %1902 = vpow2.f32 %v1003_v44  ;;  %v893_v6 = vsub.f32 %v2526_v5, %v824_v27  ;;  %v894_v40 = vsub.f32 %v2527_v39, %v824_v27  ;;  %1300 = vmatprep.mubr.f32.mxu0 %v1893_v52  ;;  %v1098_v28 = vadd.f32 %v1893_v52, %v1891_v41  ;;  %v2538_v52 = vld [vmem:[#allocation18_spill] sm:$0xff] }
 0x370   : > { %1904 = vpow2.f32 %v1005_v51  ;;  %1301 = vmatmul.mubr.f32.gmra.mrb[44].mxu0 %v1891_v41 }
 0x371   : > { %v1895_v50 = vpop.eup %1894  ;;  %v1007_v53 = vmul.f32 1.442695, %v893_v6  ;;  %v1009_v59 = vmul.f32 1.442695, %v894_v40  ;;  %1099 = vadd.xlane.f32.xlu1 %v1098_v28 }
 0x372   : > { %v1897_v62 = vpop.eup %1896  ;;  %v827_v54 = vpop.xlane.xlu1 %826 }
 0x373   : > { %1906 = vpow2.f32 %v1007_v53  ;;  %v895_v10 = vsub.f32 %v2528_v9, %v827_v54  ;;  %v896_v30 = vsub.f32 %v2529_v55, %v827_v54  ;;  %1305 = vmatprep.mubr.f32.mxu0 %v1897_v62  ;;  %v1101_v31 = vadd.f32 %v1897_v62, %v1895_v50 }
 0x374   : > { %1908 = vpow2.f32 %v1009_v59  ;;  %1306 = vmatmul.mubr.f32.gmra.mrb[46].mxu0 %v1895_v50 }
 0x375   : > { %v1899_v38 = vpop.eup %1898  ;;  %v1011_v42 = vmul.f32 1.442695, %v895_v10  ;;  %v1013_v43 = vmul.f32 1.442695, %v896_v30  ;;  %1102 = vadd.xlane.f32.xlu0 %v1101_v31 }
 0x376   : > { %v1901_v12 = vpop.eup %1900  ;;  %v830_v13 = vpop.xlane.xlu1 %829 }
 0x377   : > { %1910 = vpow2.f32 %v1011_v42  ;;  %v897_v57 = vsub.f32 %v2530_v11, %v830_v13  ;;  %v898_v20 = vsub.f32 %v2531_v58, %v830_v13  ;;  %1310 = vmatprep.mubr.f32.mxu0 %v1901_v12  ;;  %v1104_v47 = vadd.f32 %v1901_v12, %v1899_v38 }
 0x378   : > { %1912 = vpow2.f32 %v1013_v43  ;;  %1311 = vmatmul.mubr.f32.gmra.mrb[48].mxu0 %v1899_v38 }
 0x379   : > { %v1903_v33 = vpop.eup %1902  ;;  %v1015_v15 = vmul.f32 1.442695, %v897_v57  ;;  %v1017_v16 = vmul.f32 1.442695, %v898_v20  ;;  %1105 = vadd.xlane.f32.xlu0 %v1104_v47 }
 0x37a   : > { %v1905_v34 = vpop.eup %1904  ;;  %v833_v21 = vpop.xlane.xlu1 %832 }
 0x37b   : > { %1914 = vpow2.f32 %v1015_v15  ;;  %v899_v60 = vsub.f32 %v2532_v45, %v833_v21  ;;  %v900_v46 = vsub.f32 %v2533_v61, %v833_v21  ;;  %1315 = vmatprep.mubr.f32.mxu0 %v1905_v34  ;;  %v1107_v18 = vadd.f32 %v1905_v34, %v1903_v33 }
 0x37c   : > { %1916 = vpow2.f32 %v1017_v16  ;;  %1316 = vmatmul.mubr.f32.gmra.mrb[50].mxu0 %v1903_v33 }
 0x37d   : > { %v1907_v19 = vpop.eup %1906  ;;  %v1019_v22 = vmul.f32 1.442695, %v899_v60  ;;  %v1021_v29 = vmul.f32 1.442695, %v900_v46  ;;  %1108 = vadd.xlane.f32.xlu0 %v1107_v18 }
 0x37e   : > { %v1909_v56 = vpop.eup %1908  ;;  %v836_v24 = vpop.xlane.xlu1 %835 }
 0x37f   : > { %1918 = vpow2.f32 %v1019_v22  ;;  %v901_v63 = vsub.f32 %v2534_v25, %v836_v24  ;;  %v902_v26 = vsub.f32 %v2535_v23, %v836_v24  ;;  %1320 = vmatprep.mubr.f32.mxu0 %v1909_v56  ;;  %v1110_v0 = vadd.f32 %v1909_v56, %v1907_v19 }
 0x380   : > { %1920 = vpow2.f32 %v1021_v29  ;;  %1321 = vmatmul.mubr.f32.gmra.mrb[52].mxu0 %v1907_v19 }
 0x381   : > { %v1911_v36 = vpop.eup %1910  ;;  %v1023_v48 = vmul.f32 1.442695, %v901_v63  ;;  %v1025_v49 = vmul.f32 1.442695, %v902_v26  ;;  %1111 = vadd.xlane.f32.xlu0 %v1110_v0 }
 0x382   : > { %v1913_v37 = vpop.eup %1912  ;;  %v839_v4 = vpop.xlane.xlu1 %838 }
 0x383   : > { %1922 = vpow2.f32 %v1023_v48  ;;  %v903_v35 = vsub.f32 %v2536_v32, %v839_v4  ;;  %v904_v2 = vsub.f32 %v2537_v7, %v839_v4  ;;  %1325 = vmatprep.mubr.f32.mxu0 %v1913_v37  ;;  %v1113_v3 = vadd.f32 %v1913_v37, %v1911_v36 }
 0x384   : > { %1924 = vpow2.f32 %v1025_v49  ;;  %1326 = vmatmul.mubr.f32.gmra.mrb[54].mxu0 %v1911_v36 }
 0x385   : > { %v1915_v17 = vpop.eup %1914  ;;  %v1027_v1 = vmul.f32 1.442695, %v903_v35  ;;  %v1029_v8 = vmul.f32 1.442695, %v904_v2  ;;  %1114 = vadd.xlane.f32.xlu0 %v1113_v3 }
 0x386   : > { %v1917_v41 = vpop.eup %1916  ;;  %v842_v44 = vpop.xlane.xlu1 %841 }
 0x387   : > { %1926 = vpow2.f32 %v1027_v1  ;;  %v905_v51 = vsub.f32 %v2358_v14, %v842_v44  ;;  %v906_v27 = vsub.f32 %v2538_v52, %v842_v44  ;;  %1330 = vmatprep.mubr.f32.mxu0 %v1917_v41  ;;  %v1116_v5 = vadd.f32 %v1917_v41, %v1915_v17 }
 0x388   : > { %1928 = vpow2.f32 %v1029_v8  ;;  %1331 = vmatmul.mubr.f32.gmra.mrb[56].mxu0 %v1915_v17 }
 0x389   : > { %v1919_v6 = vpop.eup %1918  ;;  %v1031_v39 = vmul.f32 1.442695, %v905_v51  ;;  %v1033_v40 = vmul.f32 1.442695, %v906_v27  ;;  %1117 = vadd.xlane.f32.xlu0 %v1116_v5 }
 0x38a   : > { %v1921_v28 = vpop.eup %1920 }
 0x38b   : > { %1930 = vpow2.f32 %v1031_v39  ;;  %1335 = vmatprep.mubr.f32.mxu0 %v1921_v28  ;;  %v1119_v50 = vadd.f32 %v1921_v28, %v1919_v6 }
 0x38c   : > { %1932 = vpow2.f32 %v1033_v40  ;;  %1336 = vmatmul.mubr.f32.gmra.mrb[58].mxu0 %v1919_v6 }
 0x38d   : > { %v1923_v53 = vpop.eup %1922  ;;  %1120 = vadd.xlane.f32.xlu0 %v1119_v50 }
 0x38e   : > { %v1925_v59 = vpop.eup %1924 }
 0x38f   : > { %1340 = vmatprep.mubr.f32.mxu0 %v1925_v59  ;;  %v1122_v14 = vadd.f32 %v1925_v59, %v1923_v53 }
 0x390   : > { %1341 = vmatmul.mubr.f32.gmra.mrb[60].mxu0 %v1923_v53 }
 0x391   : > { %v1927_v62 = vpop.eup %1926  ;;  %1123 = vadd.xlane.f32.xlu0 %v1122_v14 }
 0x392   : > { %v1929_v54 = vpop.eup %1928 }
 0x393   : > { %1345 = vmatprep.mubr.f32.mxu0 %v1929_v54  ;;  %v1125_v9 = vadd.f32 %v1929_v54, %v1927_v62 }
 0x394   : > { %1346 = vmatmul.mubr.f32.gmra.mrb[62].mxu0 %v1927_v62 }
 0x395   : > { %v1931_v10 = vpop.eup %1930  ;;  %1126 = vadd.xlane.f32.xlu0 %v1125_v9 }
 0x396   : > { %v1933_v55 = vpop.eup %1932 }
 0x397   : > { %1350 = vmatprep.mubr.f32.mxu0 %v1933_v55  ;;  %v1128_v30 = vadd.f32 %v1933_v55, %v1931_v10 }
 0x398   : > { %1351 = vmatmul.mubr.f32.gmra.mrb[64].mxu0 %v1931_v10 }
 0x399   : > { %1129 = vadd.xlane.f32.xlu0 %v1128_v30 }
 0x3aa   : > { %v1037_v31 = vpop.xlane.xlu1 %1036 }
 0x3ab   : > { %1934 = vrcp.f32 %v1037_v31 }
 0x3ae   : > { %v1040_v38 = vpop.xlane.xlu1 %1039 }
 0x3af   : > { %1936 = vrcp.f32 %v1040_v38 }
 0x3b2   : > { %v1043_v42 = vpop.xlane.xlu1 %1042 }
 0x3b3   : > { %1938 = vrcp.f32 %v1043_v42 }
 0x3b5   : > { %v1935_v47 = vpop.eup %1934 }
 0x3b6   : > { %v1046_v43 = vpop.xlane.xlu1 %1045 }
 0x3b7   : > { %1940 = vrcp.f32 %v1046_v43 }
 0x3b9   : > { %v1937_v34 = vpop.eup %1936 }
 0x3ba   : > { %v1049_v12 = vpop.xlane.xlu1 %1048 }
 0x3bb   : > { %1942 = vrcp.f32 %v1049_v12 }
 0x3bd   : > { %v1939_v46 = vpop.eup %1938 }
 0x3be   : > { %v1052_v13 = vpop.xlane.xlu1 %1051 }
 0x3bf   : > { %1944 = vrcp.f32 %v1052_v13 }
 0x3c1   : > { %v1941_v56 = vpop.eup %1940 }
 0x3c2   : > { %v1055_v11 = vpop.xlane.xlu1 %1054 }
 0x3c3   : > { %1946 = vrcp.f32 %v1055_v11 }
 0x3c5   : > { %v1943_v23 = vpop.eup %1942 }
 0x3c6   : > { %v1058_v57 = vpop.xlane.xlu1 %1057 }
 0x3c7   : > { %1948 = vrcp.f32 %v1058_v57 }
 0x3c9   : > { %v1945_v49 = vpop.eup %1944 }
 0x3ca   : > { %v1061_v58 = vpop.xlane.xlu1 %1060 }
 0x3cb   : > { %1950 = vrcp.f32 %v1061_v58 }
 0x3cd   : > { %v1947_v7 = vpop.eup %1946 }
 0x3ce   : > { %v1064_v20 = vpop.xlane.xlu1 %1063 }
 0x3cf   : > { %1952 = vrcp.f32 %v1064_v20 }
 0x3d1   : > { %v1949_v1 = vpop.eup %1948 }
 0x3d2   : > { %v1067_v45 = vpop.xlane.xlu1 %1066 }
 0x3d3   : > { %1954 = vrcp.f32 %v1067_v45 }
 0x3d5   : > { %v1951_v52 = vpop.eup %1950 }
 0x3d6   : > { %v1070_v29 = vpop.xlane.xlu1 %1069 }
 0x3d7   : > { %1956 = vrcp.f32 %v1070_v29 }
 0x3d9   : > { %v1953_v40 = vpop.eup %1952 }
 0x3da   : > { %v1073_v0 = vpop.xlane.xlu1 %1072 }
 0x3db   : > { %1958 = vrcp.f32 %v1073_v0 }
 0x3dd   : > { %v1955_v59 = vpop.eup %1954 }
 0x3de   : > { %v1076_v35 = vpop.xlane.xlu1 %1075 }
 0x3df   : > { %1960 = vrcp.f32 %v1076_v35 }
 0x3e1   : > { %v1957_v10 = vpop.eup %1956 }
 0x3e2   : > { %v1079_v41 = vpop.xlane.xlu1 %1078 }
 0x3e3   : > { %1962 = vrcp.f32 %v1079_v41 }
 0x3e5   : > { %v1959_v42 = vpop.eup %1958 }
 0x3e6   : > { %v1082_v39 = vpop.xlane.xlu1 %1081 }
 0x3e7   : > { %1964 = vrcp.f32 %v1082_v39 }
 0x3e9   : > { %v1961_v11 = vpop.eup %1960 }
 0x3ea   : > { %v1085_v62 = vpop.xlane.xlu1 %1084 }
 0x3eb   : > { %1966 = vrcp.f32 %v1085_v62 }
 0x3ee   : > { %v1088_v38 = vpop.xlane.xlu1 %1087 }
 0x3ef   : > { %v1197_v33 = vpop.f32.mrb[2].mxu0  ;;  %1968 = vrcp.f32 %v1088_v38 }
 0x3f0   : > { %v1388_v15 = vmul.f32 %v1935_v47, %v1197_v33  ;;  %v1199_v16 = vpop.f32.mrb[3].mxu0  ;;  %v1963_v33 = vpop.eup %1962 }
 0x3f2   : > { %1420 = vxpose.xlu1.b32.start [1/16] (narrow) %v1388_v15, 8  ;;  %v1091_v58 = vpop.xlane.xlu1 %1090 }
 0x3f3   : > { %v1202_v21 = vpop.f32.mrb[4].mxu0  ;;  %1970 = vrcp.f32 %v1091_v58 }
 0x3f4   : > { %v1389_v60 = vmul.f32 %v1937_v34, %v1202_v21  ;;  %v1204_v61 = vpop.f32.mrb[5].mxu0 }
 0x3f6   : > { %1421 = vxpose.xlu1.b32.cont [2/16] (narrow) %v1389_v60, 8  ;;  %v1094_v45 = vpop.xlane.xlu1 %1093  ;;  %v1965_v60 = vpop.eup %1964 }
 0x3f7   : > { %v1207_v18 = vpop.f32.mrb[6].mxu0  ;;  %1972 = vrcp.f32 %v1094_v45 }
 0x3f8   : > { %v1390_v19 = vmul.f32 %v1939_v46, %v1207_v18  ;;  %v1209_v22 = vpop.f32.mrb[7].mxu0 }
 0x3f9   : > { %v1967_v22 = vpop.eup %1966 }
 0x3fa   : > { %1422 = vxpose.xlu1.b32.cont [3/16] (narrow) %v1390_v19, 8 }
 0x3fb   : > { %v1212_v24 = vpop.f32.mrb[8].mxu0 }
 0x3fc   : > { %v1391_v25 = vmul.f32 %v1941_v56, %v1212_v24  ;;  %v1214_v63 = vpop.f32.mrb[9].mxu0  ;;  %v1097_v56 = vpop.xlane.xlu1 %1096 }
 0x3fd   : > { %v1969_v63 = vpop.eup %1968  ;;  %1974 = vrcp.f32 %v1097_v56 }
 0x3fe   : > { %1423 = vxpose.xlu1.b32.cont [4/16] (narrow) %v1391_v25, 8 }
 0x3ff   : > { %v1217_v26 = vpop.f32.mrb[10].mxu0 }
 0x400   : > { %v1392_v36 = vmul.f32 %v1943_v23, %v1217_v26  ;;  %v1219_v48 = vpop.f32.mrb[11].mxu0 }
 0x401   : > { %v1100_v48 = vpop.xlane.xlu1 %1099 }
 0x402   : > { %1424 = vxpose.xlu1.b32.cont [5/16] (narrow) %v1392_v36, 8  ;;  %v1103_v16 = vpop.xlane.xlu0 %1102  ;;  %1976 = vrcp.f32 %v1100_v48 }
 0x403   : > { %v1222_v37 = vpop.f32.mrb[12].mxu0  ;;  %1978 = vrcp.f32 %v1103_v16 }
 0x404   : > { %v1393_v4 = vmul.f32 %v1945_v49, %v1222_v37  ;;  %v1224_v32 = vpop.f32.mrb[13].mxu0  ;;  %v1971_v49 = vpop.eup %1970 }
 0x406   : > { %1425 = vxpose.xlu1.b32.cont [6/16] (narrow) %v1393_v4, 8  ;;  %v1106_v19 = vpop.xlane.xlu0 %1105 }
 0x407   : > { %v1227_v2 = vpop.f32.mrb[14].mxu0  ;;  %1980 = vrcp.f32 %v1106_v19 }
 0x408   : > { %v1394_v3 = vmul.f32 %v1947_v7, %v1227_v2  ;;  %v1229_v17 = vpop.f32.mrb[15].mxu0  ;;  %v1973_v7 = vpop.eup %1972 }
 0x40a   : > { %1426 = vxpose.xlu1.b32.cont [7/16] (narrow) %v1394_v3, 8  ;;  %v1109_v26 = vpop.xlane.xlu0 %1108 }
 0x40b   : > { %v1232_v8 = vpop.f32.mrb[16].mxu0  ;;  %1982 = vrcp.f32 %v1109_v26 }
 0x40c   : > { %v1395_v44 = vmul.f32 %v1949_v1, %v1232_v8  ;;  %v1234_v51 = vpop.f32.mrb[17].mxu0  ;;  %v1975_v1 = vpop.eup %1974 }
 0x40e   : > { %1427 = vxpose.xlu1.b32.cont [8/16] (narrow) %v1395_v44, 8  ;;  %v1112_v35 = vpop.xlane.xlu0 %1111 }
 0x40f   : > { %v1237_v27 = vpop.f32.mrb[18].mxu0  ;;  %1984 = vrcp.f32 %v1112_v35  ;;  %v2539_v35 = vmov 0.0  }
 0x410   : > { %v1396_v5 = vmul.f32 %v1951_v52, %v1237_v27  ;;  %v1239_v6 = vpop.f32.mrb[19].mxu0  ;;  %v1977_v52 = vpop.eup %1976 }
 0x412   : > { %1428 = vxpose.xlu1.b32.cont [9/16] (narrow) %v1396_v5, 8  ;;  %v1115_v41 = vpop.xlane.xlu0 %1114 }
 0x413   : > { %v1242_v28 = vpop.f32.mrb[20].mxu0  ;;  %1986 = vrcp.f32 %v1115_v41 }
 0x414   : > { %v1397_v50 = vmul.f32 %v1953_v40, %v1242_v28  ;;  %v1244_v53 = vpop.f32.mrb[21].mxu0  ;;  %v1979_v40 = vpop.eup %1978 }
 0x416   : > { %1429 = vxpose.xlu1.b32.cont [10/16] (narrow) %v1397_v50, 8  ;;  %v1118_v39 = vpop.xlane.xlu0 %1117 }
 0x417   : > { %v1247_v14 = vpop.f32.mrb[22].mxu0  ;;  %1988 = vrcp.f32 %v1118_v39 }
 0x418   : > { %v1398_v54 = vmul.f32 %v1955_v59, %v1247_v14  ;;  %v1249_v9 = vpop.f32.mrb[23].mxu0  ;;  %v1981_v59 = vpop.eup %1980 }
 0x41a   : > { %1430 = vxpose.xlu1.b32.cont [11/16] (narrow) %v1398_v54, 8  ;;  %v1121_v62 = vpop.xlane.xlu0 %1120 }
 0x41b   : > { %v1252_v55 = vpop.f32.mrb[24].mxu0  ;;  %1990 = vrcp.f32 %v1121_v62 }
 0x41c   : > { %v1399_v30 = vmul.f32 %v1957_v10, %v1252_v55  ;;  %v1254_v31 = vpop.f32.mrb[25].mxu0  ;;  %v1983_v10 = vpop.eup %1982 }
 0x41e   : > { %1431 = vxpose.xlu1.b32.cont [12/16] (narrow) %v1399_v30, 8  ;;  %v1124_v38 = vpop.xlane.xlu0 %1123 }
 0x41f   : > { %v1257_v43 = vpop.f32.mrb[26].mxu0  ;;  %1992 = vrcp.f32 %v1124_v38 }
 0x420   : > { %v1400_v12 = vmul.f32 %v1959_v42, %v1257_v43  ;;  %v1259_v13 = vpop.f32.mrb[27].mxu0  ;;  %v1985_v42 = vpop.eup %1984 }
 0x422   : > { %1432 = vxpose.xlu1.b32.cont [13/16] (narrow) %v1400_v12, 8  ;;  %v1127_v58 = vpop.xlane.xlu0 %1126 }
 0x423   : > { %v1262_v57 = vpop.f32.mrb[28].mxu0  ;;  %1994 = vrcp.f32 %v1127_v58 }
 0x424   : > { %v1401_v20 = vmul.f32 %v1961_v11, %v1262_v57  ;;  %v1264_v47 = vpop.f32.mrb[29].mxu0  ;;  %v1987_v11 = vpop.eup %1986 }
 0x426   : > { %1433 = vxpose.xlu1.b32.cont [14/16] (narrow) %v1401_v20, 8 }
 0x427   : > { %v1267_v15 = vpop.f32.mrb[30].mxu0 }
 0x428   : > { %v1402_v34 = vmul.f32 %v1963_v33, %v1267_v15  ;;  %v1269_v21 = vpop.f32.mrb[31].mxu0  ;;  %v1989_v33 = vpop.eup %1988 }
 0x429   : > { %v1130_v21 = vpop.xlane.xlu0 %1129  ;;  %v1991_v45 = vpop.eup %1990 }
 0x42a   : > { %1434 = vxpose.xlu1.b32.cont [15/16] (narrow) %v1402_v34, 8  ;;  %1996 = vrcp.f32 %v1130_v21 }
 0x42b   : > { %v1272_v61 = vpop.f32.mrb[32].mxu0 }
 0x42c   : > { %v1403_v46 = vmul.f32 %v1965_v60, %v1272_v61  ;;  %v1274_v18 = vpop.f32.mrb[33].mxu0 }
 0x42d   : > { %v1993_v18 = vpop.eup %1992 }
 0x42e   : > { %1435 = vxpose.xlu1.b32.end [16/16] (narrow) %v1403_v46, 8  ;;  %v1995_v56 = vpop.eup %1994 }
 0x42f   : > { %v1277_v29 = vpop.f32.mrb[34].mxu0 }
 0x430   : > { %v1404_v24 = vmul.f32 %v1967_v22, %v1277_v29  ;;  %v1279_v25 = vpop.f32.mrb[35].mxu0 }
 0x432   : > { %1452 = vxpose.xlu0.b32.start [1/16] (narrow) %v1404_v24, 8 }
 0x433   : > { %v1282_v23 = vpop.f32.mrb[36].mxu0 }
 0x434   : > { %v1405_v0 = vmul.f32 %v1969_v63, %v1282_v23  ;;  %v1284_v36 = vpop.f32.mrb[37].mxu0  ;;  %v1997_v23 = vpop.eup %1996 }
 0x436   : > { %1453 = vxpose.xlu0.b32.cont [2/16] (narrow) %v1405_v0, 8 }
 0x437   : > { %v1287_v37 = vpop.f32.mrb[38].mxu0 }
 0x438   : > { %v1406_v4 = vmul.f32 %v1971_v49, %v1287_v37  ;;  %v1289_v32 = vpop.f32.mrb[39].mxu0 }
 0x439   : > { %v1489_v32 = vld [vmem:[%s2495_s2] sm:$0xff] }
 0x43a   : > { %1454 = vxpose.xlu0.b32.cont [3/16] (narrow) %v1406_v4, 8 }
 0x43b   : > { %v1292_v2 = vpop.f32.mrb[40].mxu0 }
 0x43c   : > { %v1407_v3 = vmul.f32 %v1973_v7, %v1292_v2  ;;  %v1294_v17 = vpop.f32.mrb[41].mxu0  ;;  %v1490_v7 = vld [vmem:[%s2495_s2 + $0x8] sm:$0xff]  ;;  %v1491_v2 = vld [vmem:[%s2495_s2 + $0x10] sm:$0xff] }
 0x43d   : > { %v1494_v17 = vld [vmem:[%s2091_s30] sm:$0xff] }
 0x43e   : > { %1455 = vxpose.xlu0.b32.cont [4/16] (narrow) %v1407_v3, 8  ;;  %v1492_v3 = vld [vmem:[%s2495_s2 + $0x18] sm:$0xff] }
 0x43f   : > { %v1297_v8 = vpop.f32.mrb[42].mxu0 }
 0x440   : > { %v1408_v44 = vmul.f32 %v1975_v1, %v1297_v8  ;;  %v1299_v51 = vpop.f32.mrb[43].mxu0  ;;  %v1495_v1 = vld [vmem:[%s2091_s30 + $0x8] sm:$0xff] }
 0x442   : > { %1456 = vxpose.xlu0.b32.cont [5/16] (narrow) %v1408_v44, 8 }
 0x443   : > { %v1302_v27 = vpop.f32.mrb[44].mxu0 }
 0x444   : > { %v1409_v5 = vmul.f32 %v1977_v52, %v1302_v27  ;;  %v1304_v6 = vpop.f32.mrb[45].mxu0  ;;  %v1496_v52 = vld [vmem:[%s2091_s30 + $0x10] sm:$0xff]  ;;  %v1497_v27 = vld [vmem:[%s2091_s30 + $0x18] sm:$0xff] }
 0x446   : > { %1457 = vxpose.xlu0.b32.cont [6/16] (narrow) %v1409_v5, 8 }
 0x447   : > { %v1307_v28 = vpop.f32.mrb[46].mxu0 }
 0x448   : > { %v1410_v50 = vmul.f32 %v1979_v40, %v1307_v28  ;;  %v1309_v53 = vpop.f32.mrb[47].mxu0  ;;  %v1498_v28 = vld [vmem:[%s2091_s30 + $0x20] sm:$0xff] }
 0x44a   : > { %1458 = vxpose.xlu0.b32.cont [7/16] (narrow) %v1410_v50, 8  ;;  %v1499_v50 = vld [vmem:[%s2091_s30 + $0x28] sm:$0xff] }
 0x44b   : > { %v1312_v14 = vpop.f32.mrb[48].mxu0 }
 0x44c   : > { %v1411_v54 = vmul.f32 %v1981_v59, %v1312_v14  ;;  %v1314_v9 = vpop.f32.mrb[49].mxu0 }
 0x44d   : > { %v1501_v9 = vld [vmem:[%s2091_s30 + $0x38] sm:$0xff] }
 0x44e   : > { %1459 = vxpose.xlu0.b32.cont [8/16] (narrow) %v1411_v54, 8  ;;  %v1500_v54 = vld [vmem:[%s2091_s30 + $0x30] sm:$0xff] }
 0x44f   : > { %v1317_v55 = vpop.f32.mrb[50].mxu0 }
 0x450   : > { %v1412_v30 = vmul.f32 %v1983_v10, %v1317_v55  ;;  %v1319_v31 = vpop.f32.mrb[51].mxu0 }
 0x452   : > { %1460 = vxpose.xlu0.b32.cont [9/16] (narrow) %v1412_v30, 8 }
 0x453   : > { %v1322_v43 = vpop.f32.mrb[52].mxu0 }
 0x454   : > { %v1413_v12 = vmul.f32 %v1985_v42, %v1322_v43  ;;  %v1324_v13 = vpop.f32.mrb[53].mxu0 }
 0x456   : > { %1461 = vxpose.xlu0.b32.cont [10/16] (narrow) %v1413_v12, 8 }
 0x457   : > { %v1327_v57 = vpop.f32.mrb[54].mxu0 }
 0x458   : > { %v1414_v20 = vmul.f32 %v1987_v11, %v1327_v57  ;;  %v1329_v47 = vpop.f32.mrb[55].mxu0 }
 0x45a   : > { %1462 = vxpose.xlu0.b32.cont [11/16] (narrow) %v1414_v20, 8 }
 0x45b   : > { %v1332_v15 = vpop.f32.mrb[56].mxu0 }
 0x45c   : > { %v1415_v16 = vmul.f32 %v1989_v33, %v1332_v15  ;;  %v1334_v34 = vpop.f32.mrb[57].mxu0 }
 0x45e   : > { %1463 = vxpose.xlu0.b32.cont [12/16] (narrow) %v1415_v16, 8 }
 0x45f   : > { %v1337_v60 = vpop.f32.mrb[58].mxu0 }
 0x460   : > { %v1416_v61 = vmul.f32 %v1991_v45, %v1337_v60  ;;  %v1339_v46 = vpop.f32.mrb[59].mxu0 }
 0x462   : > { %1464 = vxpose.xlu0.b32.cont [13/16] (narrow) %v1416_v61, 8 }
 0x463   : > { %v1342_v19 = vpop.f32.mrb[60].mxu0 }
 0x464   : > { %v1417_v22 = vmul.f32 %v1993_v18, %v1342_v19  ;;  %v1344_v29 = vpop.f32.mrb[61].mxu0 }
 0x466   : > { %1465 = vxpose.xlu0.b32.cont [14/16] (narrow) %v1417_v22, 8 }
 0x467   : > { %v1347_v24 = vpop.f32.mrb[62].mxu0 }
 0x468   : > { %v1418_v25 = vmul.f32 %v1995_v56, %v1347_v24  ;;  %v1349_v63 = vpop.f32.mrb[63].mxu0 }
 0x46a   : > { %1466 = vxpose.xlu0.b32.cont [15/16] (narrow) %v1418_v25, 8 }
 0x46b   : > { %v1352_v26 = vpop.f32.mrb[64].mxu0 }
 0x46c   : > { %v1419_v0 = vmul.f32 %v1997_v23, %v1352_v26  ;;  %v1354_v36 = vpop.f32.mrb[65].mxu0 }
 0x46e   : > { %1467 = vxpose.xlu0.b32.end [16/16] (narrow) %v1419_v0, 8 }
 0x472   : > { %v1436_v48 = vpop.trf.xlu1 }
 0x4b2   : > { %v1468_v49 = vpop.trf.xlu0 }
 0x4b3   : > { %v1486_v37 = vcombine.low %v1436_v48, %v1468_v49  ;;  %v1772_v4 = vcombine.low %v1468_v49, %v1468_v49 }
 0x4b5   : > { %1759 = vmatprep.subr.msk.mxu1 %vm297_vm1, %v1772_v4 }
 0x4b6   : > { %1760 = vmatpush1.msk.msra.mxu1 %vm297_vm1, %v1486_v37 }
 0x4b7   : > { %1761 = vmatmul.mubr.msk.f32.vlgmr.msra.gmra.mrb[64].mxu1 %vm389_vm2, %v1489_v32 }
 0x4b8   : > { %1590 = vmatprep.mubr.f32.mxu1 %v2539_v35 }
 0x4bb   : > { %1762 = vmatmul.mubr.msk.f32.gmra.mrb[66].mxu1 %vm389_vm2, %v1490_v7 }
 0x4bc   : > { %1596 = vmatprep.mubr.f32.mxu1 %v2539_v35 }
 0x4bf   : > { %1763 = vmatmul.mubr.msk.f32.gmra.mrb[68].mxu1 %vm389_vm2, %v1491_v2 }
 0x4c0   : > { %1602 = vmatprep.mubr.f32.mxu1 %v2539_v35 }
 0x4c3   : > { %1764 = vmatmul.mubr.msk.f32.gmra.mrb[70].mxu1 %vm389_vm2, %v1492_v3 }
 0x58a   : > { %v1586_v8 = vpop.f32.mrb[64].mxu1 }
 0x58b   : > { %v1587_v41 = vadd.f32 %v1586_v8, %v1494_v17  ;;  %v1588_v44 = vpop.f32.mrb[65].mxu1 }
 0x58c   : > { %v1589_v51 = vadd.f32 %v1588_v44, %v1495_v1 }
 0x58d   : > { %1609 = vst [vmem:[%s2453_s18] sm:$0xff] %v1587_v41 }
 0x58e   : > { %1610 = vst [vmem:[%s2453_s18 + $0x8] sm:$0xff] %v1589_v51  ;;  %v1592_v5 = vpop.f32.mrb[66].mxu1 }
 0x58f   : > { %v1593_v6 = vadd.f32 %v1592_v5, %v1496_v52  ;;  %v1594_v39 = vpop.f32.mrb[67].mxu1 }
 0x590   : > { %v1595_v40 = vadd.f32 %v1594_v39, %v1497_v27 }
 0x591   : > { %1611 = vst [vmem:[%s2453_s18 + $0x10] sm:$0xff] %v1593_v6 }
 0x592   : > { %1612 = vst [vmem:[%s2453_s18 + $0x18] sm:$0xff] %v1595_v40  ;;  %v1598_v53 = vpop.f32.mrb[68].mxu1 }
 0x593   : > { %v1599_v59 = vadd.f32 %v1598_v53, %v1498_v28  ;;  %v1600_v14 = vpop.f32.mrb[69].mxu1 }
 0x594   : > { %v1601_v62 = vadd.f32 %v1600_v14, %v1499_v50  ;;  %1623 = sbr.rel (!%p2073_p5) target bundleno = 1443 (0x5a3), region = 59  ;;  %v1639_v38 = vld [vmem:[%s2453_s18] sm:$0xff] (%p2073_p5) }
 0x595   : > { %1613 = vst [vmem:[%s2453_s18 + $0x20] sm:$0xff] %v1599_v59  ;;  %v1641_v42 = vld [vmem:[%s2453_s18 + $0x8] sm:$0xff] (%p2073_p5)  ;;  %1640 = vst [vmem:[%s1626_s24] sm:$0xff] (%p2073_p5), %v1639_v38 }
 0x596   : > { %1614 = vst [vmem:[%s2453_s18 + $0x28] sm:$0xff] %v1601_v62  ;;  %v1604_v10 = vpop.f32.mrb[70].mxu1  ;;  %1642 = vst [vmem:[%s1626_s24 + $0x8] sm:$0xff] (%p2073_p5), %v1641_v42 }
 0x597   : > { %v1605_v55 = vadd.f32 %v1604_v10, %v1500_v54  ;;  %v1606_v30 = vpop.f32.mrb[71].mxu1 }
 0x598   : > { %v1607_v31 = vadd.f32 %v1606_v30, %v1501_v9  ;;  %v1643_v43 = vld [vmem:[%s2453_s18 + $0x10] sm:$0xff] (%p2073_p5) }
 0x599   : > { %1615 = vst [vmem:[%s2453_s18 + $0x30] sm:$0xff] %v1605_v55  ;;  %v1645_v12 = vld [vmem:[%s2453_s18 + $0x18] sm:$0xff] (%p2073_p5)  ;;  %1644 = vst [vmem:[%s1626_s24 + $0x20] sm:$0xff] (%p2073_p5), %v1643_v43 }
 0x59a   : > { %1616 = vst [vmem:[%s2453_s18 + $0x38] sm:$0xff] %v1607_v31  ;;  %1646 = vst [vmem:[%s1626_s24 + $0x28] sm:$0xff] (%p2073_p5), %v1645_v12 }
 0x59c   : > { %v1647_v13 = vld [vmem:[%s2453_s18 + $0x20] sm:$0xff] }
 0x59d   : > { %v1649_v11 = vld [vmem:[%s2453_s18 + $0x28] sm:$0xff]  ;;  %1648 = vst [vmem:[%s1626_s24 + $0x40] sm:$0xff] %v1647_v13 }
 0x59e   : > { %1650 = vst [vmem:[%s1626_s24 + $0x48] sm:$0xff] %v1649_v11 }
 0x5a0   : > { %v1651_v57 = vld [vmem:[%s2453_s18 + $0x30] sm:$0xff] }
 0x5a1   : > { %v1653_v58 = vld [vmem:[%s2453_s18 + $0x38] sm:$0xff]  ;;  %1652 = vst [vmem:[%s1626_s24 + $0x60] sm:$0xff] %v1651_v57 }
 0x5a2   : > { %1654 = vst [vmem:[%s1626_s24 + $0x68] sm:$0xff] %v1653_v58 }
 0x5a3 PF: > { %p10_p10 = scmp.ge.s32.totalorder %s2060_s16, 4   ;;  %s2540_s12 = smov %s2016_s13 }
 0x5a4   : > { %s2541_s13 = smov %s2071_s19  ;;  %s2542_s14 = smov %s2060_s16 }
 0x5a5   :  { %12 = sbr.rel (!%p10_p10) target bundleno = 2 (0x2), region = 113 }

</bundles_post_ra>
